<compile_context>
chip_gen: v7x
topology: tpu7x:2x2x1
jax: 0.10.0
libtpu: 0.0.40
codegen_flags: <defaults>
</compile_context>

<pallas_src>
import numpy as np
import jax
import jax.numpy as jnp
from jax import lax
from jax.experimental import pallas as pl
from jax.experimental.pallas import tpu as pltpu

SHIFT = 22.9409


def _pool_select_matrix(W, dtype):
    """(W, W) 0/1 matrix: de-interleaves even/odd columns of a W-wide row into
    two contiguous Wo-wide lane groups (y @ S)[:, wo] = y[:, 2*wo], etc."""
    Wo = W // 2
    S = np.zeros((W, W), dtype=np.float32)
    wo = np.arange(Wo)
    S[2 * wo,     wo     ] = 1.0   # even columns -> lanes [0, Wo)
    S[2 * wo + 1, Wo + wo] = 1.0   # odd  columns -> lanes [Wo, 2*Wo)
    return jnp.asarray(S, dtype=dtype)


def _pick_hb(Ho, N, min_steps=4, max_rows=256):
    """Pooled-output rows per grid block: keep sublane counts multiples of 8,
    expose >= min_steps parallel grid steps (>= 2 per v7x TensorCore for
    megacore sharding + DMA/compute pipelining), cap block rows loosely."""
    hb = Ho
    while hb % 2 == 0 and (hb // 2) % 8 == 0 and \
            (N * (Ho // hb) < min_steps or hb > max_rows):
        hb //= 2
    return hb


def _conv_pool_relu_kernel(x_ref, w_ref, b_ref, s_ref, o_ref, acc_ref):
    # x_ref:   (1, Cin, HB, 2W)  f32 VMEM  (row-pair packed on lanes)
    # w_ref:   (Cout, Cin)       f32 SMEM  (1x1 conv weights, scalar reads)
    # b_ref:   (Cout, 1, 1)      f32 VMEM  (bias with -SHIFT folded in)
    # s_ref:   (W, W)            f32 VMEM  (even/odd column selection matrix)
    # o_ref:   (1, Cout, HB, Wo) f32 VMEM  (NCHW output block)
    # acc_ref: (Cout*HB, W)      f32 VMEM  scratch (vertically-pooled conv)
    _, Cin, HB, L = x_ref.shape
    W = L // 2
    Cout = o_ref.shape[1]
    Wo = o_ref.shape[3]

    # Per-channel input tiles, loaded once (each (HB, 2W), lane-dense).
    xs = [x_ref[0, c] for c in range(Cin)]

    # Weight-only 1x1 conv (VPU FMAs) + vertical row-pair max (lane-half max),
    # written straight into scratch -> only a handful of live vregs per iter.
    for o in range(Cout):
        acc = xs[0] * w_ref[o, 0]
        for c in range(1, Cin):
            acc = acc + xs[c] * w_ref[o, c]
        acc_ref[o * HB:(o + 1) * HB, :] = jnp.maximum(acc[:, :W], acc[:, W:])

    # Horizontal even/odd de-interleave via exact 0/1 selection matmul (MXU,
    # otherwise idle), pinned to full precision so values pass through exactly.
    t = jnp.dot(acc_ref[...], s_ref[...],
                preferred_element_type=jnp.float32,
                precision=lax.Precision.HIGHEST)          # (Cout*HB, W)
    p = jnp.maximum(t[:, :Wo], t[:, Wo:])                 # (Cout*HB, Wo)

    # Bias(-SHIFT) + ReLU on the pooled result (4x fewer VPU ops than
    # pre-pool), then one NCHW store (reshape splits only the sublane axis).
    p3 = p.reshape(Cout, HB, Wo) + b_ref[...]
    o_ref[0] = jnp.maximum(p3, 0.0).astype(o_ref.dtype)
    # TODO(synk): if this kernel ever becomes store-bound at larger H/W, pack
    # 4 pooled rows onto lanes for a lane-dense (.., 4*Wo) output slab.


def model_forward(x_nchw, conv_w, conv_b):
    """x_nchw: (N, Cin, H, W);  conv_w: (Cout, Cin, 1, 1);  conv_b: (Cout,)"""
    N, Cin, H, W = x_nchw.shape
    Cout = conv_w.shape[0]
    assert H % 2 == 0 and W % 2 == 0, "kernel assumes even H, W for 2x2 pooling"
    Ho, Wo = H // 2, W // 2
    L = 2 * W

    HB = _pick_hb(Ho, N)
    assert Ho % HB == 0 and (HB % 8 == 0 or HB == Ho), (Ho, HB)
    n_hb = Ho // HB

    # Free (contiguous) reshape: lane l in [0,W)  -> pixel (2*ho,   l),
    #                            lane l in [W,2W) -> pixel (2*ho+1, l-W).
    x2 = x_nchw.reshape(N, Cin, Ho, L)

    w2 = conv_w.reshape(Cout, Cin)                            # scalars -> SMEM
    b3 = (conv_b - SHIFT).reshape(Cout, 1, 1).astype(x2.dtype)  # fold shift
    sel = _pool_select_matrix(W, x2.dtype)                    # (W, W)

    out = pl.pallas_call(
        _conv_pool_relu_kernel,
        out_shape=jax.ShapeDtypeStruct((N, Cout, Ho, Wo), x2.dtype),
        grid=(N, n_hb),
        in_specs=[
            pl.BlockSpec((1, Cin, HB, L), lambda n, h: (n, 0, h, 0)),
            pl.BlockSpec(memory_space=pltpu.MemorySpace.SMEM),
            pl.BlockSpec((Cout, 1, 1), lambda n, h: (0, 0, 0)),
            pl.BlockSpec((W, W), lambda n, h: (0, 0)),
        ],
        out_specs=pl.BlockSpec((1, Cout, HB, Wo), lambda n, h: (n, 0, h, 0)),
        scratch_shapes=[pltpu.VMEM((Cout * HB, W), jnp.float32)],
        compiler_params=pltpu.CompilerParams(
            dimension_semantics=("parallel", "parallel")),
    )(x2, w2, b3, sel)

    return out   # already NCHW: (N, Cout, Ho, Wo)


def _reference(x, conv_w, conv_b):
    N, Cin, H, W = x.shape
    Cout = conv_w.shape[0]
    w = conv_w.reshape(Cout, Cin)
    # elementwise + reduce (avoids MXU-precision einsum) for a tight tolerance
    y = (x[:, None, :, :, :] * w[None, :, :, None, None]).sum(axis=2)
    y = y + conv_b[None, :, None, None] - SHIFT
    y = jnp.maximum(y, 0.0)
    y = y.reshape(N, Cout, H // 2, 2, W // 2, 2)
    return jnp.max(y, axis=(3, 5))


if __name__ == "__main__":
    key = jax.random.PRNGKey(0)
    k_x, k_w, k_b = jax.random.split(key, 3)

    # Shapes consistent with the module: Conv2d(3, 16, 1), MaxPool2d(2), 64x64 input.
    N, Cin, H, W = 2, 3, 64, 64
    Cout = 16

    # Scale inputs so ReLU(conv - 22.9409) is not identically zero (meaningful check).
    x = 30.0 * jax.random.normal(k_x, (N, Cin, H, W), dtype=jnp.float32)
    fan_in = Cin * 1 * 1
    bound = 1.0 / (fan_in ** 0.5)
    conv_w = jax.random.uniform(k_w, (Cout, Cin, 1, 1), jnp.float32, -bound, bound)
    conv_b = jax.random.uniform(k_b, (Cout,), jnp.float32, -bound, bound)

    out = jax.block_until_ready(model_forward(x, conv_w, conv_b))
    ref = _reference(x, conv_w, conv_b)

    assert out.shape == (N, Cout, H // 2, W // 2), out.shape
    assert jnp.allclose(out, ref, atol=1e-4, rtol=1e-5), "mismatch vs reference"

    print("KERNEL_OK")
</pallas_src>

<mosaic_0001>
module attributes {stable_mosaic.version = 11 : i64} {
  func.func @_conv_pool_relu_kernel(%arg0: i32, %arg1: i32, %arg2: memref<1x3x16x128xf32, #tpu.memory_space<vmem>>, %arg3: memref<16x3xf32, #tpu.memory_space<smem>>, %arg4: memref<16x1x1xf32, #tpu.memory_space<vmem>>, %arg5: memref<64x64xf32, #tpu.memory_space<vmem>>, %arg6: memref<1x16x16x32xf32, #tpu.memory_space<vmem>>, %arg7: memref<256x64xf32, #tpu.memory_space<vmem>>) attributes {dimension_semantics = [#tpu.dimension_semantics<parallel>, #tpu.dimension_semantics<parallel>], iteration_bounds = array<i64: 2, 2>, scalar_prefetch = 0 : i64, scratch_operands = 1 : i64, tpu.core_type = #tpu.core_type<tc>, window_params = [{transform_indices = @transform_0, window_bounds = array<i64: 1, 3, 16, 128>}, {transform_indices = @transform_1, window_bounds = array<i64: 16, 3>}, {pipeline_mode = #tpu.pipeline_mode<synchronous>, transform_indices = @transform_2, window_bounds = array<i64: 16, 1, 1>}, {pipeline_mode = #tpu.pipeline_mode<synchronous>, transform_indices = @transform_3, window_bounds = array<i64: 64, 64>}, {transform_indices = @transform_4, window_bounds = array<i64: 1, 16, 16, 32>}]} {
    %c0 = arith.constant 0 : index
    %c0_0 = arith.constant 0 : index
    %c0_1 = arith.constant 0 : index
    %c0_2 = arith.constant 0 : index
    %0 = vector.load %arg2[%c0, %c0_0, %c0_1, %c0_2] : memref<1x3x16x128xf32, #tpu.memory_space<vmem>>, vector<1x1x16x128xf32>
    %1 = vector.shape_cast %0 : vector<1x1x16x128xf32> to vector<16x128xf32>
    %c0_3 = arith.constant 0 : index
    %c1 = arith.constant 1 : index
    %c0_4 = arith.constant 0 : index
    %c0_5 = arith.constant 0 : index
    %2 = vector.load %arg2[%c0_3, %c1, %c0_4, %c0_5] : memref<1x3x16x128xf32, #tpu.memory_space<vmem>>, vector<1x1x16x128xf32>
    %3 = vector.shape_cast %2 : vector<1x1x16x128xf32> to vector<16x128xf32>
    %c0_6 = arith.constant 0 : index
    %c2 = arith.constant 2 : index
    %c0_7 = arith.constant 0 : index
    %c0_8 = arith.constant 0 : index
    %4 = vector.load %arg2[%c0_6, %c2, %c0_7, %c0_8] : memref<1x3x16x128xf32, #tpu.memory_space<vmem>>, vector<1x1x16x128xf32>
    %5 = vector.shape_cast %4 : vector<1x1x16x128xf32> to vector<16x128xf32>
    %c0_9 = arith.constant 0 : index
    %c0_10 = arith.constant 0 : index
    %6 = memref.load %arg3[%c0_9, %c0_10] : memref<16x3xf32, #tpu.memory_space<smem>>
    %7 = vector.broadcast %6 : f32 to vector<16x128xf32>
    %8 = arith.mulf %1, %7 : vector<16x128xf32>
    %c0_11 = arith.constant 0 : index
    %c1_12 = arith.constant 1 : index
    %9 = memref.load %arg3[%c0_11, %c1_12] : memref<16x3xf32, #tpu.memory_space<smem>>
    %10 = vector.broadcast %9 : f32 to vector<16x128xf32>
    %11 = arith.mulf %3, %10 : vector<16x128xf32>
    %12 = arith.addf %8, %11 : vector<16x128xf32>
    %c0_13 = arith.constant 0 : index
    %c2_14 = arith.constant 2 : index
    %13 = memref.load %arg3[%c0_13, %c2_14] : memref<16x3xf32, #tpu.memory_space<smem>>
    %14 = vector.broadcast %13 : f32 to vector<16x128xf32>
    %15 = arith.mulf %5, %14 : vector<16x128xf32>
    %16 = arith.addf %12, %15 : vector<16x128xf32>
    %17 = vector.extract_strided_slice %16 {offsets = [0, 0], sizes = [16, 64], strides = [1, 1]} : vector<16x128xf32> to vector<16x64xf32>
    %18 = vector.extract_strided_slice %16 {offsets = [0, 64], sizes = [16, 64], strides = [1, 1]} : vector<16x128xf32> to vector<16x64xf32>
    %19 = arith.maximumf %17, %18 : vector<16x64xf32>
    %c0_15 = arith.constant 0 : index
    %c0_16 = arith.constant 0 : index
    %20 = vector.load %arg7[%c0_15, %c0_16] : memref<256x64xf32, #tpu.memory_space<vmem>>, vector<16x64xf32>
    tpu.vector_store %arg7[%c0_15, %c0_16], %19 {strides = array<i32>} : memref<256x64xf32, #tpu.memory_space<vmem>>, vector<16x64xf32>,
    %c1_17 = arith.constant 1 : index
    %c0_18 = arith.constant 0 : index
    %21 = memref.load %arg3[%c1_17, %c0_18] : memref<16x3xf32, #tpu.memory_space<smem>>
    %22 = vector.broadcast %21 : f32 to vector<16x128xf32>
    %23 = arith.mulf %1, %22 : vector<16x128xf32>
    %c1_19 = arith.constant 1 : index
    %c1_20 = arith.constant 1 : index
    %24 = memref.load %arg3[%c1_19, %c1_20] : memref<16x3xf32, #tpu.memory_space<smem>>
    %25 = vector.broadcast %24 : f32 to vector<16x128xf32>
    %26 = arith.mulf %3, %25 : vector<16x128xf32>
    %27 = arith.addf %23, %26 : vector<16x128xf32>
    %c1_21 = arith.constant 1 : index
    %c2_22 = arith.constant 2 : index
    %28 = memref.load %arg3[%c1_21, %c2_22] : memref<16x3xf32, #tpu.memory_space<smem>>
    %29 = vector.broadcast %28 : f32 to vector<16x128xf32>
    %30 = arith.mulf %5, %29 : vector<16x128xf32>
    %31 = arith.addf %27, %30 : vector<16x128xf32>
    %32 = vector.extract_strided_slice %31 {offsets = [0, 0], sizes = [16, 64], strides = [1, 1]} : vector<16x128xf32> to vector<16x64xf32>
    %33 = vector.extract_strided_slice %31 {offsets = [0, 64], sizes = [16, 64], strides = [1, 1]} : vector<16x128xf32> to vector<16x64xf32>
    %34 = arith.maximumf %32, %33 : vector<16x64xf32>
    %c16 = arith.constant 16 : index
    %c0_23 = arith.constant 0 : index
    %35 = vector.load %arg7[%c16, %c0_23] : memref<256x64xf32, #tpu.memory_space<vmem>>, vector<16x64xf32>
    tpu.vector_store %arg7[%c16, %c0_23], %34 {strides = array<i32>} : memref<256x64xf32, #tpu.memory_space<vmem>>, vector<16x64xf32>,
    %c2_24 = arith.constant 2 : index
    %c0_25 = arith.constant 0 : index
    %36 = memref.load %arg3[%c2_24, %c0_25] : memref<16x3xf32, #tpu.memory_space<smem>>
    %37 = vector.broadcast %36 : f32 to vector<16x128xf32>
    %38 = arith.mulf %1, %37 : vector<16x128xf32>
    %c2_26 = arith.constant 2 : index
    %c1_27 = arith.constant 1 : index
    %39 = memref.load %arg3[%c2_26, %c1_27] : memref<16x3xf32, #tpu.memory_space<smem>>
    %40 = vector.broadcast %39 : f32 to vector<16x128xf32>
    %41 = arith.mulf %3, %40 : vector<16x128xf32>
    %42 = arith.addf %38, %41 : vector<16x128xf32>
    %c2_28 = arith.constant 2 : index
    %c2_29 = arith.constant 2 : index
    %43 = memref.load %arg3[%c2_28, %c2_29] : memref<16x3xf32, #tpu.memory_space<smem>>
    %44 = vector.broadcast %43 : f32 to vector<16x128xf32>
    %45 = arith.mulf %5, %44 : vector<16x128xf32>
    %46 = arith.addf %42, %45 : vector<16x128xf32>
    %47 = vector.extract_strided_slice %46 {offsets = [0, 0], sizes = [16, 64], strides = [1, 1]} : vector<16x128xf32> to vector<16x64xf32>
    %48 = vector.extract_strided_slice %46 {offsets = [0, 64], sizes = [16, 64], strides = [1, 1]} : vector<16x128xf32> to vector<16x64xf32>
    %49 = arith.maximumf %47, %48 : vector<16x64xf32>
    %c32 = arith.constant 32 : index
    %c0_30 = arith.constant 0 : index
    %50 = vector.load %arg7[%c32, %c0_30] : memref<256x64xf32, #tpu.memory_space<vmem>>, vector<16x64xf32>
    tpu.vector_store %arg7[%c32, %c0_30], %49 {strides = array<i32>} : memref<256x64xf32, #tpu.memory_space<vmem>>, vector<16x64xf32>,
    %c3 = arith.constant 3 : index
    %c0_31 = arith.constant 0 : index
    %51 = memref.load %arg3[%c3, %c0_31] : memref<16x3xf32, #tpu.memory_space<smem>>
    %52 = vector.broadcast %51 : f32 to vector<16x128xf32>
    %53 = arith.mulf %1, %52 : vector<16x128xf32>
    %c3_32 = arith.constant 3 : index
    %c1_33 = arith.constant 1 : index
    %54 = memref.load %arg3[%c3_32, %c1_33] : memref<16x3xf32, #tpu.memory_space<smem>>
    %55 = vector.broadcast %54 : f32 to vector<16x128xf32>
    %56 = arith.mulf %3, %55 : vector<16x128xf32>
    %57 = arith.addf %53, %56 : vector<16x128xf32>
    %c3_34 = arith.constant 3 : index
    %c2_35 = arith.constant 2 : index
    %58 = memref.load %arg3[%c3_34, %c2_35] : memref<16x3xf32, #tpu.memory_space<smem>>
    %59 = vector.broadcast %58 : f32 to vector<16x128xf32>
    %60 = arith.mulf %5, %59 : vector<16x128xf32>
    %61 = arith.addf %57, %60 : vector<16x128xf32>
    %62 = vector.extract_strided_slice %61 {offsets = [0, 0], sizes = [16, 64], strides = [1, 1]} : vector<16x128xf32> to vector<16x64xf32>
    %63 = vector.extract_strided_slice %61 {offsets = [0, 64], sizes = [16, 64], strides = [1, 1]} : vector<16x128xf32> to vector<16x64xf32>
    %64 = arith.maximumf %62, %63 : vector<16x64xf32>
    %c48 = arith.constant 48 : index
    %c0_36 = arith.constant 0 : index
    %65 = vector.load %arg7[%c48, %c0_36] : memref<256x64xf32, #tpu.memory_space<vmem>>, vector<16x64xf32>
    tpu.vector_store %arg7[%c48, %c0_36], %64 {strides = array<i32>} : memref<256x64xf32, #tpu.memory_space<vmem>>, vector<16x64xf32>,
    %c4 = arith.constant 4 : index
    %c0_37 = arith.constant 0 : index
    %66 = memref.load %arg3[%c4, %c0_37] : memref<16x3xf32, #tpu.memory_space<smem>>
    %67 = vector.broadcast %66 : f32 to vector<16x128xf32>
    %68 = arith.mulf %1, %67 : vector<16x128xf32>
    %c4_38 = arith.constant 4 : index
    %c1_39 = arith.constant 1 : index
    %69 = memref.load %arg3[%c4_38, %c1_39] : memref<16x3xf32, #tpu.memory_space<smem>>
    %70 = vector.broadcast %69 : f32 to vector<16x128xf32>
    %71 = arith.mulf %3, %70 : vector<16x128xf32>
    %72 = arith.addf %68, %71 : vector<16x128xf32>
    %c4_40 = arith.constant 4 : index
    %c2_41 = arith.constant 2 : index
    %73 = memref.load %arg3[%c4_40, %c2_41] : memref<16x3xf32, #tpu.memory_space<smem>>
    %74 = vector.broadcast %73 : f32 to vector<16x128xf32>
    %75 = arith.mulf %5, %74 : vector<16x128xf32>
    %76 = arith.addf %72, %75 : vector<16x128xf32>
    %77 = vector.extract_strided_slice %76 {offsets = [0, 0], sizes = [16, 64], strides = [1, 1]} : vector<16x128xf32> to vector<16x64xf32>
    %78 = vector.extract_strided_slice %76 {offsets = [0, 64], sizes = [16, 64], strides = [1, 1]} : vector<16x128xf32> to vector<16x64xf32>
    %79 = arith.maximumf %77, %78 : vector<16x64xf32>
    %c64 = arith.constant 64 : index
    %c0_42 = arith.constant 0 : index
    %80 = vector.load %arg7[%c64, %c0_42] : memref<256x64xf32, #tpu.memory_space<vmem>>, vector<16x64xf32>
    tpu.vector_store %arg7[%c64, %c0_42], %79 {strides = array<i32>} : memref<256x64xf32, #tpu.memory_space<vmem>>, vector<16x64xf32>,
    %c5 = arith.constant 5 : index
    %c0_43 = arith.constant 0 : index
    %81 = memref.load %arg3[%c5, %c0_43] : memref<16x3xf32, #tpu.memory_space<smem>>
    %82 = vector.broadcast %81 : f32 to vector<16x128xf32>
    %83 = arith.mulf %1, %82 : vector<16x128xf32>
    %c5_44 = arith.constant 5 : index
    %c1_45 = arith.constant 1 : index
    %84 = memref.load %arg3[%c5_44, %c1_45] : memref<16x3xf32, #tpu.memory_space<smem>>
    %85 = vector.broadcast %84 : f32 to vector<16x128xf32>
    %86 = arith.mulf %3, %85 : vector<16x128xf32>
    %87 = arith.addf %83, %86 : vector<16x128xf32>
    %c5_46 = arith.constant 5 : index
    %c2_47 = arith.constant 2 : index
    %88 = memref.load %arg3[%c5_46, %c2_47] : memref<16x3xf32, #tpu.memory_space<smem>>
    %89 = vector.broadcast %88 : f32 to vector<16x128xf32>
    %90 = arith.mulf %5, %89 : vector<16x128xf32>
    %91 = arith.addf %87, %90 : vector<16x128xf32>
    %92 = vector.extract_strided_slice %91 {offsets = [0, 0], sizes = [16, 64], strides = [1, 1]} : vector<16x128xf32> to vector<16x64xf32>
    %93 = vector.extract_strided_slice %91 {offsets = [0, 64], sizes = [16, 64], strides = [1, 1]} : vector<16x128xf32> to vector<16x64xf32>
    %94 = arith.maximumf %92, %93 : vector<16x64xf32>
    %c80 = arith.constant 80 : index
    %c0_48 = arith.constant 0 : index
    %95 = vector.load %arg7[%c80, %c0_48] : memref<256x64xf32, #tpu.memory_space<vmem>>, vector<16x64xf32>
    tpu.vector_store %arg7[%c80, %c0_48], %94 {strides = array<i32>} : memref<256x64xf32, #tpu.memory_space<vmem>>, vector<16x64xf32>,
    %c6 = arith.constant 6 : index
    %c0_49 = arith.constant 0 : index
    %96 = memref.load %arg3[%c6, %c0_49] : memref<16x3xf32, #tpu.memory_space<smem>>
    %97 = vector.broadcast %96 : f32 to vector<16x128xf32>
    %98 = arith.mulf %1, %97 : vector<16x128xf32>
    %c6_50 = arith.constant 6 : index
    %c1_51 = arith.constant 1 : index
    %99 = memref.load %arg3[%c6_50, %c1_51] : memref<16x3xf32, #tpu.memory_space<smem>>
    %100 = vector.broadcast %99 : f32 to vector<16x128xf32>
    %101 = arith.mulf %3, %100 : vector<16x128xf32>
    %102 = arith.addf %98, %101 : vector<16x128xf32>
    %c6_52 = arith.constant 6 : index
    %c2_53 = arith.constant 2 : index
    %103 = memref.load %arg3[%c6_52, %c2_53] : memref<16x3xf32, #tpu.memory_space<smem>>
    %104 = vector.broadcast %103 : f32 to vector<16x128xf32>
    %105 = arith.mulf %5, %104 : vector<16x128xf32>
    %106 = arith.addf %102, %105 : vector<16x128xf32>
    %107 = vector.extract_strided_slice %106 {offsets = [0, 0], sizes = [16, 64], strides = [1, 1]} : vector<16x128xf32> to vector<16x64xf32>
    %108 = vector.extract_strided_slice %106 {offsets = [0, 64], sizes = [16, 64], strides = [1, 1]} : vector<16x128xf32> to vector<16x64xf32>
    %109 = arith.maximumf %107, %108 : vector<16x64xf32>
    %c96 = arith.constant 96 : index
    %c0_54 = arith.constant 0 : index
    %110 = vector.load %arg7[%c96, %c0_54] : memref<256x64xf32, #tpu.memory_space<vmem>>, vector<16x64xf32>
    tpu.vector_store %arg7[%c96, %c0_54], %109 {strides = array<i32>} : memref<256x64xf32, #tpu.memory_space<vmem>>, vector<16x64xf32>,
    %c7 = arith.constant 7 : index
    %c0_55 = arith.constant 0 : index
    %111 = memref.load %arg3[%c7, %c0_55] : memref<16x3xf32, #tpu.memory_space<smem>>
    %112 = vector.broadcast %111 : f32 to vector<16x128xf32>
    %113 = arith.mulf %1, %112 : vector<16x128xf32>
    %c7_56 = arith.constant 7 : index
    %c1_57 = arith.constant 1 : index
    %114 = memref.load %arg3[%c7_56, %c1_57] : memref<16x3xf32, #tpu.memory_space<smem>>
    %115 = vector.broadcast %114 : f32 to vector<16x128xf32>
    %116 = arith.mulf %3, %115 : vector<16x128xf32>
    %117 = arith.addf %113, %116 : vector<16x128xf32>
    %c7_58 = arith.constant 7 : index
    %c2_59 = arith.constant 2 : index
    %118 = memref.load %arg3[%c7_58, %c2_59] : memref<16x3xf32, #tpu.memory_space<smem>>
    %119 = vector.broadcast %118 : f32 to vector<16x128xf32>
    %120 = arith.mulf %5, %119 : vector<16x128xf32>
    %121 = arith.addf %117, %120 : vector<16x128xf32>
    %122 = vector.extract_strided_slice %121 {offsets = [0, 0], sizes = [16, 64], strides = [1, 1]} : vector<16x128xf32> to vector<16x64xf32>
    %123 = vector.extract_strided_slice %121 {offsets = [0, 64], sizes = [16, 64], strides = [1, 1]} : vector<16x128xf32> to vector<16x64xf32>
    %124 = arith.maximumf %122, %123 : vector<16x64xf32>
    %c112 = arith.constant 112 : index
    %c0_60 = arith.constant 0 : index
    %125 = vector.load %arg7[%c112, %c0_60] : memref<256x64xf32, #tpu.memory_space<vmem>>, vector<16x64xf32>
    tpu.vector_store %arg7[%c112, %c0_60], %124 {strides = array<i32>} : memref<256x64xf32, #tpu.memory_space<vmem>>, vector<16x64xf32>,
    %c8 = arith.constant 8 : index
    %c0_61 = arith.constant 0 : index
    %126 = memref.load %arg3[%c8, %c0_61] : memref<16x3xf32, #tpu.memory_space<smem>>
    %127 = vector.broadcast %126 : f32 to vector<16x128xf32>
    %128 = arith.mulf %1, %127 : vector<16x128xf32>
    %c8_62 = arith.constant 8 : index
    %c1_63 = arith.constant 1 : index
    %129 = memref.load %arg3[%c8_62, %c1_63] : memref<16x3xf32, #tpu.memory_space<smem>>
    %130 = vector.broadcast %129 : f32 to vector<16x128xf32>
    %131 = arith.mulf %3, %130 : vector<16x128xf32>
    %132 = arith.addf %128, %131 : vector<16x128xf32>
    %c8_64 = arith.constant 8 : index
    %c2_65 = arith.constant 2 : index
    %133 = memref.load %arg3[%c8_64, %c2_65] : memref<16x3xf32, #tpu.memory_space<smem>>
    %134 = vector.broadcast %133 : f32 to vector<16x128xf32>
    %135 = arith.mulf %5, %134 : vector<16x128xf32>
    %136 = arith.addf %132, %135 : vector<16x128xf32>
    %137 = vector.extract_strided_slice %136 {offsets = [0, 0], sizes = [16, 64], strides = [1, 1]} : vector<16x128xf32> to vector<16x64xf32>
    %138 = vector.extract_strided_slice %136 {offsets = [0, 64], sizes = [16, 64], strides = [1, 1]} : vector<16x128xf32> to vector<16x64xf32>
    %139 = arith.maximumf %137, %138 : vector<16x64xf32>
    %c128 = arith.constant 128 : index
    %c0_66 = arith.constant 0 : index
    %140 = vector.load %arg7[%c128, %c0_66] : memref<256x64xf32, #tpu.memory_space<vmem>>, vector<16x64xf32>
    tpu.vector_store %arg7[%c128, %c0_66], %139 {strides = array<i32>} : memref<256x64xf32, #tpu.memory_space<vmem>>, vector<16x64xf32>,
    %c9 = arith.constant 9 : index
    %c0_67 = arith.constant 0 : index
    %141 = memref.load %arg3[%c9, %c0_67] : memref<16x3xf32, #tpu.memory_space<smem>>
    %142 = vector.broadcast %141 : f32 to vector<16x128xf32>
    %143 = arith.mulf %1, %142 : vector<16x128xf32>
    %c9_68 = arith.constant 9 : index
    %c1_69 = arith.constant 1 : index
    %144 = memref.load %arg3[%c9_68, %c1_69] : memref<16x3xf32, #tpu.memory_space<smem>>
    %145 = vector.broadcast %144 : f32 to vector<16x128xf32>
    %146 = arith.mulf %3, %145 : vector<16x128xf32>
    %147 = arith.addf %143, %146 : vector<16x128xf32>
    %c9_70 = arith.constant 9 : index
    %c2_71 = arith.constant 2 : index
    %148 = memref.load %arg3[%c9_70, %c2_71] : memref<16x3xf32, #tpu.memory_space<smem>>
    %149 = vector.broadcast %148 : f32 to vector<16x128xf32>
    %150 = arith.mulf %5, %149 : vector<16x128xf32>
    %151 = arith.addf %147, %150 : vector<16x128xf32>
    %152 = vector.extract_strided_slice %151 {offsets = [0, 0], sizes = [16, 64], strides = [1, 1]} : vector<16x128xf32> to vector<16x64xf32>
    %153 = vector.extract_strided_slice %151 {offsets = [0, 64], sizes = [16, 64], strides = [1, 1]} : vector<16x128xf32> to vector<16x64xf32>
    %154 = arith.maximumf %152, %153 : vector<16x64xf32>
    %c144 = arith.constant 144 : index
    %c0_72 = arith.constant 0 : index
    %155 = vector.load %arg7[%c144, %c0_72] : memref<256x64xf32, #tpu.memory_space<vmem>>, vector<16x64xf32>
    tpu.vector_store %arg7[%c144, %c0_72], %154 {strides = array<i32>} : memref<256x64xf32, #tpu.memory_space<vmem>>, vector<16x64xf32>,
    %c10 = arith.constant 10 : index
    %c0_73 = arith.constant 0 : index
    %156 = memref.load %arg3[%c10, %c0_73] : memref<16x3xf32, #tpu.memory_space<smem>>
    %157 = vector.broadcast %156 : f32 to vector<16x128xf32>
    %158 = arith.mulf %1, %157 : vector<16x128xf32>
    %c10_74 = arith.constant 10 : index
    %c1_75 = arith.constant 1 : index
    %159 = memref.load %arg3[%c10_74, %c1_75] : memref<16x3xf32, #tpu.memory_space<smem>>
    %160 = vector.broadcast %159 : f32 to vector<16x128xf32>
    %161 = arith.mulf %3, %160 : vector<16x128xf32>
    %162 = arith.addf %158, %161 : vector<16x128xf32>
    %c10_76 = arith.constant 10 : index
    %c2_77 = arith.constant 2 : index
    %163 = memref.load %arg3[%c10_76, %c2_77] : memref<16x3xf32, #tpu.memory_space<smem>>
    %164 = vector.broadcast %163 : f32 to vector<16x128xf32>
    %165 = arith.mulf %5, %164 : vector<16x128xf32>
    %166 = arith.addf %162, %165 : vector<16x128xf32>
    %167 = vector.extract_strided_slice %166 {offsets = [0, 0], sizes = [16, 64], strides = [1, 1]} : vector<16x128xf32> to vector<16x64xf32>
    %168 = vector.extract_strided_slice %166 {offsets = [0, 64], sizes = [16, 64], strides = [1, 1]} : vector<16x128xf32> to vector<16x64xf32>
    %169 = arith.maximumf %167, %168 : vector<16x64xf32>
    %c160 = arith.constant 160 : index
    %c0_78 = arith.constant 0 : index
    %170 = vector.load %arg7[%c160, %c0_78] : memref<256x64xf32, #tpu.memory_space<vmem>>, vector<16x64xf32>
    tpu.vector_store %arg7[%c160, %c0_78], %169 {strides = array<i32>} : memref<256x64xf32, #tpu.memory_space<vmem>>, vector<16x64xf32>,
    %c11 = arith.constant 11 : index
    %c0_79 = arith.constant 0 : index
    %171 = memref.load %arg3[%c11, %c0_79] : memref<16x3xf32, #tpu.memory_space<smem>>
    %172 = vector.broadcast %171 : f32 to vector<16x128xf32>
    %173 = arith.mulf %1, %172 : vector<16x128xf32>
    %c11_80 = arith.constant 11 : index
    %c1_81 = arith.constant 1 : index
    %174 = memref.load %arg3[%c11_80, %c1_81] : memref<16x3xf32, #tpu.memory_space<smem>>
    %175 = vector.broadcast %174 : f32 to vector<16x128xf32>
    %176 = arith.mulf %3, %175 : vector<16x128xf32>
    %177 = arith.addf %173, %176 : vector<16x128xf32>
    %c11_82 = arith.constant 11 : index
    %c2_83 = arith.constant 2 : index
    %178 = memref.load %arg3[%c11_82, %c2_83] : memref<16x3xf32, #tpu.memory_space<smem>>
    %179 = vector.broadcast %178 : f32 to vector<16x128xf32>
    %180 = arith.mulf %5, %179 : vector<16x128xf32>
    %181 = arith.addf %177, %180 : vector<16x128xf32>
    %182 = vector.extract_strided_slice %181 {offsets = [0, 0], sizes = [16, 64], strides = [1, 1]} : vector<16x128xf32> to vector<16x64xf32>
    %183 = vector.extract_strided_slice %181 {offsets = [0, 64], sizes = [16, 64], strides = [1, 1]} : vector<16x128xf32> to vector<16x64xf32>
    %184 = arith.maximumf %182, %183 : vector<16x64xf32>
    %c176 = arith.constant 176 : index
    %c0_84 = arith.constant 0 : index
    %185 = vector.load %arg7[%c176, %c0_84] : memref<256x64xf32, #tpu.memory_space<vmem>>, vector<16x64xf32>
    tpu.vector_store %arg7[%c176, %c0_84], %184 {strides = array<i32>} : memref<256x64xf32, #tpu.memory_space<vmem>>, vector<16x64xf32>,
    %c12 = arith.constant 12 : index
    %c0_85 = arith.constant 0 : index
    %186 = memref.load %arg3[%c12, %c0_85] : memref<16x3xf32, #tpu.memory_space<smem>>
    %187 = vector.broadcast %186 : f32 to vector<16x128xf32>
    %188 = arith.mulf %1, %187 : vector<16x128xf32>
    %c12_86 = arith.constant 12 : index
    %c1_87 = arith.constant 1 : index
    %189 = memref.load %arg3[%c12_86, %c1_87] : memref<16x3xf32, #tpu.memory_space<smem>>
    %190 = vector.broadcast %189 : f32 to vector<16x128xf32>
    %191 = arith.mulf %3, %190 : vector<16x128xf32>
    %192 = arith.addf %188, %191 : vector<16x128xf32>
    %c12_88 = arith.constant 12 : index
    %c2_89 = arith.constant 2 : index
    %193 = memref.load %arg3[%c12_88, %c2_89] : memref<16x3xf32, #tpu.memory_space<smem>>
    %194 = vector.broadcast %193 : f32 to vector<16x128xf32>
    %195 = arith.mulf %5, %194 : vector<16x128xf32>
    %196 = arith.addf %192, %195 : vector<16x128xf32>
    %197 = vector.extract_strided_slice %196 {offsets = [0, 0], sizes = [16, 64], strides = [1, 1]} : vector<16x128xf32> to vector<16x64xf32>
    %198 = vector.extract_strided_slice %196 {offsets = [0, 64], sizes = [16, 64], strides = [1, 1]} : vector<16x128xf32> to vector<16x64xf32>
    %199 = arith.maximumf %197, %198 : vector<16x64xf32>
    %c192 = arith.constant 192 : index
    %c0_90 = arith.constant 0 : index
    %200 = vector.load %arg7[%c192, %c0_90] : memref<256x64xf32, #tpu.memory_space<vmem>>, vector<16x64xf32>
    tpu.vector_store %arg7[%c192, %c0_90], %199 {strides = array<i32>} : memref<256x64xf32, #tpu.memory_space<vmem>>, vector<16x64xf32>,
    %c13 = arith.constant 13 : index
    %c0_91 = arith.constant 0 : index
    %201 = memref.load %arg3[%c13, %c0_91] : memref<16x3xf32, #tpu.memory_space<smem>>
    %202 = vector.broadcast %201 : f32 to vector<16x128xf32>
    %203 = arith.mulf %1, %202 : vector<16x128xf32>
    %c13_92 = arith.constant 13 : index
    %c1_93 = arith.constant 1 : index
    %204 = memref.load %arg3[%c13_92, %c1_93] : memref<16x3xf32, #tpu.memory_space<smem>>
    %205 = vector.broadcast %204 : f32 to vector<16x128xf32>
    %206 = arith.mulf %3, %205 : vector<16x128xf32>
    %207 = arith.addf %203, %206 : vector<16x128xf32>
    %c13_94 = arith.constant 13 : index
    %c2_95 = arith.constant 2 : index
    %208 = memref.load %arg3[%c13_94, %c2_95] : memref<16x3xf32, #tpu.memory_space<smem>>
    %209 = vector.broadcast %208 : f32 to vector<16x128xf32>
    %210 = arith.mulf %5, %209 : vector<16x128xf32>
    %211 = arith.addf %207, %210 : vector<16x128xf32>
    %212 = vector.extract_strided_slice %211 {offsets = [0, 0], sizes = [16, 64], strides = [1, 1]} : vector<16x128xf32> to vector<16x64xf32>
    %213 = vector.extract_strided_slice %211 {offsets = [0, 64], sizes = [16, 64], strides = [1, 1]} : vector<16x128xf32> to vector<16x64xf32>
    %214 = arith.maximumf %212, %213 : vector<16x64xf32>
    %c208 = arith.constant 208 : index
    %c0_96 = arith.constant 0 : index
    %215 = vector.load %arg7[%c208, %c0_96] : memref<256x64xf32, #tpu.memory_space<vmem>>, vector<16x64xf32>
    tpu.vector_store %arg7[%c208, %c0_96], %214 {strides = array<i32>} : memref<256x64xf32, #tpu.memory_space<vmem>>, vector<16x64xf32>,
    %c14 = arith.constant 14 : index
    %c0_97 = arith.constant 0 : index
    %216 = memref.load %arg3[%c14, %c0_97] : memref<16x3xf32, #tpu.memory_space<smem>>
    %217 = vector.broadcast %216 : f32 to vector<16x128xf32>
    %218 = arith.mulf %1, %217 : vector<16x128xf32>
    %c14_98 = arith.constant 14 : index
    %c1_99 = arith.constant 1 : index
    %219 = memref.load %arg3[%c14_98, %c1_99] : memref<16x3xf32, #tpu.memory_space<smem>>
    %220 = vector.broadcast %219 : f32 to vector<16x128xf32>
    %221 = arith.mulf %3, %220 : vector<16x128xf32>
    %222 = arith.addf %218, %221 : vector<16x128xf32>
    %c14_100 = arith.constant 14 : index
    %c2_101 = arith.constant 2 : index
    %223 = memref.load %arg3[%c14_100, %c2_101] : memref<16x3xf32, #tpu.memory_space<smem>>
    %224 = vector.broadcast %223 : f32 to vector<16x128xf32>
    %225 = arith.mulf %5, %224 : vector<16x128xf32>
    %226 = arith.addf %222, %225 : vector<16x128xf32>
    %227 = vector.extract_strided_slice %226 {offsets = [0, 0], sizes = [16, 64], strides = [1, 1]} : vector<16x128xf32> to vector<16x64xf32>
    %228 = vector.extract_strided_slice %226 {offsets = [0, 64], sizes = [16, 64], strides = [1, 1]} : vector<16x128xf32> to vector<16x64xf32>
    %229 = arith.maximumf %227, %228 : vector<16x64xf32>
    %c224 = arith.constant 224 : index
    %c0_102 = arith.constant 0 : index
    %230 = vector.load %arg7[%c224, %c0_102] : memref<256x64xf32, #tpu.memory_space<vmem>>, vector<16x64xf32>
    tpu.vector_store %arg7[%c224, %c0_102], %229 {strides = array<i32>} : memref<256x64xf32, #tpu.memory_space<vmem>>, vector<16x64xf32>,
    %c15 = arith.constant 15 : index
    %c0_103 = arith.constant 0 : index
    %231 = memref.load %arg3[%c15, %c0_103] : memref<16x3xf32, #tpu.memory_space<smem>>
    %232 = vector.broadcast %231 : f32 to vector<16x128xf32>
    %233 = arith.mulf %1, %232 : vector<16x128xf32>
    %c15_104 = arith.constant 15 : index
    %c1_105 = arith.constant 1 : index
    %234 = memref.load %arg3[%c15_104, %c1_105] : memref<16x3xf32, #tpu.memory_space<smem>>
    %235 = vector.broadcast %234 : f32 to vector<16x128xf32>
    %236 = arith.mulf %3, %235 : vector<16x128xf32>
    %237 = arith.addf %233, %236 : vector<16x128xf32>
    %c15_106 = arith.constant 15 : index
    %c2_107 = arith.constant 2 : index
    %238 = memref.load %arg3[%c15_106, %c2_107] : memref<16x3xf32, #tpu.memory_space<smem>>
    %239 = vector.broadcast %238 : f32 to vector<16x128xf32>
    %240 = arith.mulf %5, %239 : vector<16x128xf32>
    %241 = arith.addf %237, %240 : vector<16x128xf32>
    %242 = vector.extract_strided_slice %241 {offsets = [0, 0], sizes = [16, 64], strides = [1, 1]} : vector<16x128xf32> to vector<16x64xf32>
    %243 = vector.extract_strided_slice %241 {offsets = [0, 64], sizes = [16, 64], strides = [1, 1]} : vector<16x128xf32> to vector<16x64xf32>
    %244 = arith.maximumf %242, %243 : vector<16x64xf32>
    %c240 = arith.constant 240 : index
    %c0_108 = arith.constant 0 : index
    %245 = vector.load %arg7[%c240, %c0_108] : memref<256x64xf32, #tpu.memory_space<vmem>>, vector<16x64xf32>
    tpu.vector_store %arg7[%c240, %c0_108], %244 {strides = array<i32>} : memref<256x64xf32, #tpu.memory_space<vmem>>, vector<16x64xf32>,
    %c0_109 = arith.constant 0 : index
    %c0_110 = arith.constant 0 : index
    %246 = vector.load %arg7[%c0_109, %c0_110] : memref<256x64xf32, #tpu.memory_space<vmem>>, vector<256x64xf32>
    %c0_111 = arith.constant 0 : index
    %c0_112 = arith.constant 0 : index
    %247 = vector.load %arg5[%c0_111, %c0_112] : memref<64x64xf32, #tpu.memory_space<vmem>>, vector<64x64xf32>
    %cst = arith.constant dense<0.000000e+00> : vector<256x64xf32>
    %248 = tpu.matmul %246, %247, %cst {dimension_numbers = #tpu.dot_dimension_numbers<[1], [0], [0], [1], [0, 0, 1, 1], [], []>, precision = #tpu.contract_precision<fp32>} : vector<256x64xf32>, vector<64x64xf32>, vector<256x64xf32> -> vector<256x64xf32>
    %249 = vector.extract_strided_slice %248 {offsets = [0, 0], sizes = [256, 32], strides = [1, 1]} : vector<256x64xf32> to vector<256x32xf32>
    %250 = vector.extract_strided_slice %248 {offsets = [0, 32], sizes = [256, 32], strides = [1, 1]} : vector<256x64xf32> to vector<256x32xf32>
    %251 = arith.maximumf %249, %250 : vector<256x32xf32>
    %252 = vector.shape_cast %251 : vector<256x32xf32> to vector<16x16x32xf32>
    %c0_113 = arith.constant 0 : index
    %c0_114 = arith.constant 0 : index
    %c0_115 = arith.constant 0 : index
    %253 = vector.load %arg4[%c0_113, %c0_114, %c0_115] : memref<16x1x1xf32, #tpu.memory_space<vmem>>, vector<16x1x1xf32>
    %254 = vector.broadcast %253 : vector<16x1x1xf32> to vector<16x16x32xf32>
    %255 = arith.addf %252, %254 : vector<16x16x32xf32>
    %cst_116 = arith.constant 0.000000e+00 : f32
    %256 = vector.broadcast %cst_116 : f32 to vector<16x16x32xf32>
    %257 = arith.maximumf %255, %256 : vector<16x16x32xf32>
    %c0_117 = arith.constant 0 : index
    %c0_118 = arith.constant 0 : index
    %c0_119 = arith.constant 0 : index
    %c0_120 = arith.constant 0 : index
    %258 = vector.load %arg6[%c0_117, %c0_118, %c0_119, %c0_120] : memref<1x16x16x32xf32, #tpu.memory_space<vmem>>, vector<1x16x16x32xf32>
    %259 = vector.shape_cast %258 : vector<1x16x16x32xf32> to vector<16x16x32xf32>
    %260 = vector.shape_cast %257 : vector<16x16x32xf32> to vector<1x16x16x32xf32>
    tpu.vector_store %arg6[%c0_117, %c0_118, %c0_119, %c0_120], %260 {strides = array<i32>} : memref<1x16x16x32xf32, #tpu.memory_space<vmem>>, vector<1x16x16x32xf32>,
    return
  }
  func.func @transform_0(%arg0: i32, %arg1: i32) -> (i32, i32, i32, i32) {
    %c0_i32 = arith.constant 0 : i32
    %c0_i32_0 = arith.constant 0 : i32
    %c0_i32_1 = arith.constant 0 : i32
    return %arg0, %c0_i32, %arg1, %c0_i32_0 : i32, i32, i32, i32
  }
  func.func @transform_1(%arg0: i32, %arg1: i32) -> (i32, i32) {
    %c0_i32 = arith.constant 0 : i32
    %c0_i32_0 = arith.constant 0 : i32
    %c0_i32_1 = arith.constant 0 : i32
    return %c0_i32, %c0_i32_0 : i32, i32
  }
  func.func @transform_2(%arg0: i32, %arg1: i32) -> (i32, i32, i32) {
    %c0_i32 = arith.constant 0 : i32
    %c0_i32_0 = arith.constant 0 : i32
    %c0_i32_1 = arith.constant 0 : i32
    %c0_i32_2 = arith.constant 0 : i32
    return %c0_i32, %c0_i32_0, %c0_i32_1 : i32, i32, i32
  }
  func.func @transform_3(%arg0: i32, %arg1: i32) -> (i32, i32) {
    %c0_i32 = arith.constant 0 : i32
    %c0_i32_0 = arith.constant 0 : i32
    %c0_i32_1 = arith.constant 0 : i32
    return %c0_i32, %c0_i32_0 : i32, i32
  }
  func.func @transform_4(%arg0: i32, %arg1: i32) -> (i32, i32, i32, i32) {
    %c0_i32 = arith.constant 0 : i32
    %c0_i32_0 = arith.constant 0 : i32
    %c0_i32_1 = arith.constant 0 : i32
    return %arg0, %c0_i32, %arg1, %c0_i32_0 : i32, i32, i32, i32
  }
}

</mosaic_0001>

<bundles_post_ra>
// kernel: tpu_custom_call.1
= control target key start
LH: loop header
LB: loop body
LE: loop exit
PB: predicated region body
PF: predicated region fallthrough
CT: control target
= control target key end

     0   :  { %s6092_s0 = inlined_call_operand.hbm [shape: f32[2,3,32,128], index: 0, kind: input, shape index: {}]   ;;  %s6093_s1 = inlined_call_operand.vmem [shape: f32[16,3], index: 1, kind: input, shape index: {}]   ;;  %s6094_s2 = inlined_call_operand.vmem [shape: f32[16,1,1], index: 2, kind: input, shape index: {}]   ;;  %s6095_s3 = inlined_call_operand.hbm [shape: f32[64,64], index: 3, kind: input, shape index: {}]   ;;  %s6096_s4 = inlined_call_operand.hbm [shape: f32[2,16,32,32], index: 4, kind: output, shape index: {}]  }
   0x1   :  { %6132 = sst [smem:[#allocation46_spill]] %s6093_s1 }
   0x2   :  { %6133 = sst [smem:[#allocation47_spill]] %s6095_s3 }
   0x3   :  { %9 = vsyncpa [#allocation4], 0 }
   0x4   :  { %11 = vsyncpa [#allocation4 + $0x1], 0 }
   0x5   :  { %12 = vsyncpa [#allocation6], 0 }
   0x6   :  { %13 = vsyncpa [#allocation9], 0 }
   0x7   :  { %14 = vsyncpa [#allocation5], 0 }
   0x8   :  { %16 = vsyncpa [#allocation5 + $0x1], 0  ;;  %s4594_s15 = smov 0   ;;  %s4596_s16 = smov 0  }
   0x9   :  { %s4598_s17 = smov 0   ;;  %s4600_s18 = smov 0  }
   0xa   :  { %s4602_s19 = smov 0   ;;  %s4604_s20 = smov 0  }
   0xb   :  { %s4606_s21 = smov 0   ;;  %s4608_s22 = smov 0  }
   0xc LB: > { %6134 = sst [smem:[#allocation20_spill]] %s4543_s21  ;;  %s3329_s23 = sadd.s32 4294967295, %s4547_s22   ;;  %s4547_s22 = sphi %s4608_s22, %s22_s22   ;;  %s4543_s21 = sphi %s4606_s21, %s6208_s21   ;;  %s4539_s20 = sphi %s4604_s20, %s6213_s20   ;;  %s4535_s19 = sphi %s4602_s19, %s6206_s19   ;;  %s4531_s18 = sphi %s4600_s18, %s6212_s18   ;;  %s4527_s17 = sphi %s4598_s17, %s6211_s17   ;;  %s4523_s16 = sphi %s4596_s16, %s6210_s16   ;;  %s4519_s15 = sphi %s4594_s15, %s6209_s15  }
   0xd   : > { %s3330_s24 = sadd.s32 4294967294, %s4547_s22   ;;  %s31_s25 = sadd.s32 1, %s4539_s20 }
   0xe   : > { %s34_s26 = sadd.s32 1, %s4543_s21  ;;  %p32_p0 = scmp.ge.s32.totalorder %s31_s25, 2 }
   0xf   : > { %s43_s27 = sadd.s32 1, %s4527_s17  ;;  %p50_p1 = scmp.ne.s32.totalorder %s4527_s17, %s4523_s16 }
  0x10   : > { %p51_p2 = scmp.eq.s32.totalorder %s4547_s22, 0  ;;  %s6215_s25 = smov (%p32_p0, %s31_s25), 0 }
  0x11   : > { %6135 = sst [smem:[#allocation21_spill]] %s6215_s25  ;;  %s6217_s26 = smov (!%p32_p0, %s34_s26), %s4543_s21 }
  0x12   : > { %s39_s28 = ssub.s32 %s4539_s20, %s6215_s25  ;;  %p4647_p3 = por %p51_p2, %p50_p1 }
  0x13   : > { %p36_p4 = scmp.ge.s32.totalorder %s6217_s26, 2  ;;  %p56_p5 = scmp.ne.s32.totalorder %s4523_s16, %s4519_s15 }
  0x14   : > { %p4653_p6 = scmp.eq.s32.totalorder %s3329_s23, 0  ;;  %p145_p7 = scmp.eq.s32.totalorder %s3329_s23, 3 }
  0x15   : > { %s6219_s26 = smov (%p36_p4, %s6217_s26), 0  ;;  %p151_p10 = scmp.eq.s32.totalorder %s3330_s24, 3 }
  0x16   : > { %s6137_s30 = scalar_select %p4653_p6, 1, 0 }
  0x17   : > { %6138 = sst [smem:[#allocation22_spill]] %s6219_s26  ;;  %p4661_p8 = por %p4653_p6, %p56_p5 }
  0x18   : > { %p4665_p9 = por %p145_p7, %p50_p1  ;;  %s38_s7 = ssub.s32 %s4543_s21, %s6219_s26 }
  0x19   : > { %s6139_s5 = scalar_select %p4661_p8, 1, 0 }
  0x1a   : > { %s6140_s6 = scalar_select %p4665_p9, 1, 0 }
  0x1b   : > { %s40_s8 = sor.u32 %s39_s28, %s38_s7  ;;  %p3331_p11 = scmp.ge.s32.totalorder %s4547_s22, 1 }
  0x1c   : > { %p41_p12 = scmp.eq.s32.totalorder %s40_s8, 0  ;;  %p4672_p13 = por %p151_p10, %p56_p5 }
  0x1d   : > { %p158_p0 = scmp.lt.s32.totalorder %s4547_s22, 5  ;;  %s6144_s1 = sld [smem:[#allocation46_spill]] }
  0x1e   : > { %s6141_s9 = scalar_select %p4672_p13, 1, 0 }
  0x1f   : > { %s4678_s10 = scalar_select %p41_p12, %s4527_s17, %s43_s27  }
  0x20   : > { %p4680_p2 = pnand %p3331_p11, %p158_p0  ;;  %s4549_s24 = smov [#allocation8]  }
  0x21   : > { %6142 = sst [smem:[#allocation23_spill]] %s4678_s10  ;;  %s186_s27 = sshll.u32 %s4549_s24, 4  ;;  %s4695_s27 = int_to_ptr.vmem [resolvable:$true] %s186_s27 }
  0x22   : > { %p4324_p1 = pneg %p4680_p2 }
  0x23   : > { %s170_s14 = sshll.u32 %s6144_s1, 4  ;;  %s171_s14 = int_to_ptr.vmem [resolvable:$true] %s170_s14 }
  0x24   : > { %p4691_p4 = pnand %p4324_p1, %p4653_p6  ;;  %s4426_s28 = scalar_lea.vmem %s171_s14, 256 }
  0x25   : > { %p4427_p5 = scmp.ne.s32.totalorder %s171_s14, %s4426_s28  ;;  %p4434_p12 = scmp.lt.s32.totalorder %s171_s14, %s171_s14 }
  0x26   : > { %p4428_p7 = pneg %p4691_p4  ;;  %p4435_p0 = scmp.lt.s32.totalorder %s4426_s28, %s4426_s28 }
  0x28   : > { %p4429_p10 = pnand %p4428_p7, %p4427_p5  ;;  %p4436_p1 = por %p4435_p0, %p4434_p12 }
  0x2a   : > { %p4430_p11 = pneg %p4429_p10 }
  0x2c   : > { %p4437_p13 = pnand %p4436_p1, %p4430_p11 }
  0x2e   : > { %4440 = shalt.err (!%p4437_p13)
}
  0x2f   : > { %s4550_s7 = smov [#allocation7]   ;;  %s4551_s8 = smov 128  }
  0x30   : > { %s4552_s12 = smov 8   ;;  %s6146_s3 = sld [smem:[#allocation47_spill]] }
  0x31   : > { %4327 = dma.vmem_to_smem (!%p4691_p4), %s171_s14, 256, %s4550_s7, [#allocation6], %s4551_s8, %s4551_s8, %s4552_s12  }
  0x36   : > { %s4441_s1 = scalar_lea.hbm %s6146_s3, 1024 }
  0x37   : > { %p4442_p5 = scmp.ne.s32.totalorder %s6146_s3, %s4441_s1  ;;  %p4448_p13 = scmp.lt.u32.totalorder %s4441_s1, %s6146_s3 }
  0x39   : > { %p4444_p10 = pnand %p4442_p5, %p4428_p7 }
  0x3b   : > { %p4445_p11 = pneg %p4444_p10 }
  0x3d   : > { %p4450_p12 = pnand %p4448_p13, %p4445_p11 }
  0x3f   : > { %4453 = shalt.err (!%p4450_p12)
}
  0x40   : > { %s4454_s14 = scalar_lea.vmem %s4695_s27, 1024  ;;  %p4462_p6 = scmp.lt.s32.totalorder %s4695_s27, %s4695_s27 }
  0x41   : > { %p4455_p0 = scmp.ne.s32.totalorder %s4695_s27, %s4454_s14  ;;  %p4463_p5 = scmp.lt.s32.totalorder %s4454_s14, %s4454_s14 }
  0x43   : > { %p4457_p1 = pnand %p4455_p0, %p4428_p7  ;;  %p4464_p10 = por %p4463_p5, %p4462_p6 }
  0x45   : > { %p4458_p9 = pneg %p4457_p1 }
  0x47   : > { %p4465_p8 = pnand %p4464_p10, %p4458_p9 }
  0x49   : > { %4468 = shalt.err (!%p4465_p8)
}
  0x4a   : > { %4330 = dma.hbm_to_vmem [thread:$0]  (!%p4691_p4), %s6146_s3, 1024, %s4695_s27, [#allocation9], %s4551_s8, %s4551_s8, %s4552_s12  }
  0x4b   : > { %p3334_p11 = scmp.ge.s32.totalorder %s4547_s22, 4 }
  0x4d   : > { %196 = sbr.rel (%p3334_p11) target bundleno = 100 (0x64), region = 28 }
  0x54   : > { %s200_s26 = sand.u32 1, %s4527_s17   ;;  %s3335_s7 = sshll.u32 %s4539_s20, 1 }
  0x55   : > { %s4296_s10 = smul.u32 48, %s200_s26  ;;  %s4553_s13 = smov 512  }
  0x56   : > { %s4297_s23 = smul.u32 12, %s4543_s21  ;;  %4304 = sst [smem:[#allocation12]] (%p4647_p3), %s4553_s13 }
  0x57   : > { %s204_s8 = scalar_lea.vmem [#allocation3], %s4296_s10  ;;  %s4554_s28 = smov 256  }
  0x58   : > { %s210_s27 = sadd.s32 %s4297_s23, %s3335_s7  ;;  %s225_s12 = sshll.u32 %s204_s8, 4  ;;  %s226_s12 = int_to_ptr.vmem [resolvable:$true] %s225_s12 }
  0x59   : > { %s4303_s24 = scalar_select %p4647_p3, [#allocation0], [#allocation15] }
  0x5a   : > { %4305 = sst [smem:[#allocation12 + $0x1]] (%p4647_p3), %s4554_s28  ;;  %s4555_s1 = smov 2  }
  0x5b   : > { %s217_s14 = sld [smem:[%s4303_s24]]   ;;  %s3336_s25 = sshll.u32 %s210_s27, 7 }
  0x5c   : > { %4306 = sst [smem:[#allocation12 + $0x2]] (%p4647_p3), %s4555_s1  ;;  %s4556_s3 = smov 128  }
  0x5d   : > { %4307 = sst [smem:[#allocation12 + $0x3]] (%p4647_p3), %s4556_s3  ;;  %s4557_s7 = smov 8  }
  0x5e   : > { %4308 = sst [smem:[#allocation12 + $0x4]] (%p4647_p3), %s4556_s3  ;;  %s212_s13 = scalar_lea.hbm %s6092_s0, %s3336_s25 }
  0x5f   : > { %4309 = sst [smem:[#allocation12 + $0x5]] (%p4647_p3), %s4557_s7  ;;  %s201_s24 = scalar_lea.sflag [#allocation4], %s200_s26 }
  0x60   : > { %s4558_s21 = smov [#allocation11]  }
  0x61   : > { %s3337_s8 = sshll.u32 %s217_s14, 26 }
  0x62   : > { %s3338_s28 = sadd.s32 134217728, %s3337_s8 }
  0x63   : > { %4310 = dma.general (%p4647_p3), %s212_s13, 768, %s226_s12, %s201_s24, %s4558_s21, [#allocation12], %s3338_s28, 0  }
  0x64 PF: > { %250 = sbr.rel (%p4680_p2) target bundleno = 812 (0x32c), region = 36 }
  0x6b   : > { %s4755_s3 = sand.u32 1, %s4523_s16   ;;  %p6147_p6 = scmp.ne.s32.totalorder %s6139_s5, 0 }
  0x6c   : > { %s4298_s27 = smul.u32 48, %s4755_s3  ;;  %s253_s1 = scalar_lea.sflag [#allocation4], %s4755_s3 }
  0x6e   : > { %s256_s7 = scalar_lea.vmem [#allocation3], %s4298_s27 }
  0x6f   : > { %4502 = dma.done.wait (%p6147_p6), %s253_s1, 768  }
  0x70   : > { %4504 = vsyncadd (%p6147_p6), %s253_s1, 4294966528  ;;  %p6148_p3 = scmp.ne.s32.totalorder %s6137_s30, 0 }
  0x72   : > { %4506 = dma.done.wait (%p6148_p3), [#allocation6], 256  }
  0x73   : > { %4508 = vsyncadd (%p6148_p3), [#allocation6], 4294967040 }
  0x74   : > { %4510 = dma.done.wait (%p6148_p3), [#allocation9], 1024  }
  0x75   : > { %4512 = vsyncadd (%p6148_p3), [#allocation9], 4294966272 }
  0x76   : > { %269 = sfence }
  0x77   : > { %s3349_s21 = sld [smem:[#allocation7 + $0x80]]  ;;  %s3350_s29 = sld [smem:[#allocation7 + $0x81]]  ;;  %v4771_v0 = vld [vmem:[%s256_s7] sm:$0xff]  ;;  %v4773_v1 = vld [vmem:[%s256_s7 + $0x8] sm:$0xff]  ;;  %v4787_v4 = vld [vmem:[%s256_s7 + $0x10] sm:$0xff]  ;;  %vm326_vm0 = vcmask 523264  }
  0x78   : > { %s3351_s11 = sld [smem:[#allocation7 + $0x82]]  ;;  %s300_s26 = sld [smem:[#allocation7]]  ;;  %v4783_v2 = vld [vmem:[#allocation8] sm:$0xff]  ;;  %v4785_v3 = vld [vmem:[#allocation8 + $0x8] sm:$0xff]  ;;  %vm3139_vm1 = vcmask 261120  }
  0x79   : > { %s4775_s5 = sld [smem:[#allocation7 + $0x1]]  ;;  %s4777_s12 = sld [smem:[#allocation7 + $0x2]]  ;;  %v4789_v5 = vld [vmem:[%s256_s7 + $0x18] sm:$0xff]  ;;  %v886_v6 = vand.u32 4294901760, %v4783_v2  ;;  %v6104_v7 = vand.u32 4294901760, %v4785_v3  ;;  %v4793_v8 = vld [vmem:[%s256_s7 + $0x20] sm:$0xff] }
  0x7a   : > { %s4779_s14 = sld [smem:[#allocation7 + $0x100]]  ;;  %s4781_s25 = sld [smem:[#allocation7 + $0x101]]  ;;  %v4795_v9 = vld [vmem:[%s256_s7 + $0x28] sm:$0xff] }
  0x7b   : > { %s4797_s30 = sld [smem:[#allocation7 + $0x102]]  ;;  %s4799_s10 = sld [smem:[#allocation7 + $0x180]]  ;;  %v4807_v14 = vpack.c.bf16 %v6104_v7, %v886_v6 }
  0x7c   : > { %s4811_s23 = sld [smem:[#allocation7 + $0x181]]  ;;  %s4817_s13 = sld [smem:[#allocation7 + $0x182]] }
  0x7d   : > { %v330_v10 = vstv %s3349_s21  ;;  %v334_v13 = vstv %s3350_s29  ;;  %4089 = vmatprep.subr.bf16.mxu0 %v4807_v14  ;;  %s4822_s8 = sld [smem:[#allocation7 + $0x200]]  ;;  %4041 = vmatprep.subr.bf16.mxu1 %v4807_v14  ;;  %s4830_s28 = sld [smem:[#allocation7 + $0x201]] }
  0x7e   : > { %v331_v11 = vmul.f32 %v330_v10, %v4771_v0  ;;  %v332_v12 = vmul.f32 %v330_v10, %v4773_v1  ;;  %v335_v15 = vmul.f32 %v4787_v4, %v334_v13  ;;  %v336_v16 = vmul.f32 %v4789_v5, %v334_v13  ;;  %4091 = vmatpush3.bf16.msra.mxu0 %v4807_v14  ;;  %s4832_s24 = sld [smem:[#allocation7 + $0x202]]  ;;  %s4559_s27 = smov 64  }
  0x7f   : > { %v340_v17 = vstv %s3351_s11  ;;  %v301_v18 = vstv %s300_s26  ;;  %v305_v24 = vstv %s4775_s5  ;;  %v311_v25 = vstv %s4777_s12  ;;  %4043 = vmatpush3.bf16.msra.mxu1 %v4807_v14  ;;  %s4849_s1 = sld [smem:[#allocation7 + $0x280]]  ;;  %s4851_s7 = sld [smem:[#allocation7 + $0x281]] }
  0x80   : > { %v341_v19 = vmul.f32 %v4793_v8, %v340_v17  ;;  %v342_v20 = vmul.f32 %v4795_v9, %v340_v17  ;;  %v302_v21 = vmul.f32 %v301_v18, %v4771_v0  ;;  %v303_v22 = vmul.f32 %v301_v18, %v4773_v1  ;;  %s4856_s21 = sld [smem:[#allocation7 + $0x282]]  ;;  %s4868_s29 = sld [smem:[#allocation7 + $0x300]] }
  0x81   : > { %v337_v23 = vadd.f32 %v335_v15, %v331_v11  ;;  %v338_v26 = vadd.f32 %v336_v16, %v332_v12  ;;  %v306_v27 = vmul.f32 %v4787_v4, %v305_v24  ;;  %v307_v28 = vmul.f32 %v4789_v5, %v305_v24  ;;  %s4878_s11 = sld [smem:[#allocation7 + $0x301]]  ;;  %s4880_s26 = sld [smem:[#allocation7 + $0x302]] }
  0x82   : > { %v312_v29 = vmul.f32 %v4793_v8, %v311_v25  ;;  %v313_v30 = vmul.f32 %v4795_v9, %v311_v25  ;;  %v358_v33 = vstv %s4779_s14  ;;  %v362_v34 = vstv %s4781_s25  ;;  %s4888_s5 = sld [smem:[#allocation7 + $0x380]]  ;;  %s4897_s12 = sld [smem:[#allocation7 + $0x381]] }
  0x83   : > { %v4835_v31 = vadd.f32 %v341_v19, %v337_v23  ;;  %v4837_v32 = vadd.f32 %v342_v20, %v338_v26  ;;  %v308_v35 = vadd.f32 %v306_v27, %v302_v21  ;;  %v309_v36 = vadd.f32 %v307_v28, %v303_v22  ;;  %s4899_s14 = sld [smem:[#allocation7 + $0x382]]  ;;  %s4909_s25 = sld [smem:[#allocation7 + $0x400]] }
  0x84   : > { %v360_v37 = vmul.f32 %v358_v33, %v4773_v1  ;;  %v364_v38 = vmul.f32 %v4789_v5, %v362_v34  ;;  %v368_v39 = vstv %s4797_s30  ;;  %v359_v40 = vmul.f32 %v358_v33, %v4771_v0  ;;  %s4913_s30 = sld [smem:[#allocation7 + $0x401]] }
  0x85   : > { %347 = vrot.lane.b32.xlu1 %v4835_v31, %s4559_s27  ;;  %v363_v41 = vmul.f32 %v4787_v4, %v362_v34  ;;  %v386_v42 = vstv %s4799_s10  ;;  %v4853_v43 = vadd.f32 %v312_v29, %v308_v35  ;;  %v370_v45 = vmul.f32 %v4795_v9, %v368_v39  ;;  %s4928_s10 = sld [smem:[#allocation7 + $0x402]] }
  0x86   : > { %v366_v44 = vadd.f32 %v364_v38, %v360_v37  ;;  %v369_v47 = vmul.f32 %v4793_v8, %v368_v39  ;;  %v388_v48 = vmul.f32 %v386_v42, %v4773_v1  ;;  %v390_v49 = vstv %s4811_s23  ;;  %s4935_s23 = sld [smem:[#allocation7 + $0x480]] }
  0x87   : > { %v365_v46 = vadd.f32 %v363_v41, %v359_v40  ;;  %318 = vrot.lane.b32.xlu0 %v4853_v43, %s4559_s27  ;;  %v4863_v50 = vadd.f32 %v313_v30, %v309_v36  ;;  %v392_v51 = vmul.f32 %v4789_v5, %v390_v49  ;;  %v396_v52 = vstv %s4817_s13  ;;  %s4937_s13 = sld [smem:[#allocation7 + $0x481]] }
  0x88   : > { %v387_v53 = vmul.f32 %v386_v42, %v4771_v0  ;;  %v4872_v54 = vadd.f32 %v370_v45, %v366_v44  ;;  %v398_v56 = vmul.f32 %v4795_v9, %v396_v52  ;;  %v391_v57 = vmul.f32 %v4787_v4, %v390_v49 }
  0x89   : > { %349 = vrot.lane.b32.xlu1 %v4837_v32, %s4559_s27  ;;  %v4874_v55 = vadd.f32 %v369_v47, %v365_v46  ;;  %v394_v58 = vadd.f32 %v392_v51, %v388_v48  ;;  %v414_v59 = vstv %s4822_s8  ;;  %v418_v60 = vstv %s4830_s28  ;;  %s4942_s8 = sld [smem:[#allocation7 + $0x482]]  ;;  %s4955_s28 = sld [smem:[#allocation7 + $0x500]] }
  0x8a   : > { %v424_v61 = vstv %s4832_s24  ;;  %v393_v62 = vadd.f32 %v391_v57, %v387_v53  ;;  %v397_v63 = vmul.f32 %v4793_v8, %v396_v52  ;;  %v416_v10 = vmul.f32 %v414_v59, %v4773_v1  ;;  %s4960_s24 = sld [smem:[#allocation7 + $0x501]] }
  0x8b   : > { %v420_v11 = vmul.f32 %v4789_v5, %v418_v60  ;;  %320 = vrot.lane.b32.xlu0 %v4863_v50, %s4559_s27  ;;  %v4892_v12 = vadd.f32 %v398_v56, %v394_v58  ;;  %v426_v13 = vmul.f32 %v4795_v9, %v424_v61  ;;  %v415_v15 = vmul.f32 %v414_v59, %v4771_v0 }
  0x8c   : > { %v419_v16 = vmul.f32 %v4787_v4, %v418_v60  ;;  %v425_v18 = vmul.f32 %v4793_v8, %v424_v61  ;;  %v442_v19 = vstv %s4849_s1  ;;  %v446_v20 = vstv %s4851_s7  ;;  %s4962_s1 = sld [smem:[#allocation7 + $0x502]]  ;;  %s4974_s7 = sld [smem:[#allocation7 + $0x580]] }
  0x8d   : > { %377 = vrot.lane.b32.xlu1 %v4872_v54, %s4559_s27  ;;  %v422_v17 = vadd.f32 %v420_v11, %v416_v10  ;;  %v444_v22 = vmul.f32 %v442_v19, %v4773_v1  ;;  %v448_v23 = vmul.f32 %v4789_v5, %v446_v20  ;;  %v452_v24 = vstv %s4856_s21  ;;  %s4982_s21 = sld [smem:[#allocation7 + $0x581]] }
  0x8e   : > { %v421_v21 = vadd.f32 %v419_v16, %v415_v15  ;;  %v443_v25 = vmul.f32 %v442_v19, %v4771_v0  ;;  %v447_v26 = vmul.f32 %v4787_v4, %v446_v20  ;;  %v4917_v27 = vadd.f32 %v397_v63, %v393_v62 }
  0x8f   : > { %375 = vrot.lane.b32.xlu0 %v4874_v55, %s4559_s27  ;;  %v4919_v28 = vadd.f32 %v426_v13, %v422_v17  ;;  %v454_v29 = vmul.f32 %v4795_v9, %v452_v24  ;;  %v470_v30 = vstv %s4868_s29  ;;  %v450_v33 = vadd.f32 %v448_v23, %v444_v22  ;;  %s4984_s29 = sld [smem:[#allocation7 + $0x582]] }
  0x90   : > { %v472_v34 = vmul.f32 %v470_v30, %v4773_v1  ;;  %v474_v35 = vstv %s4878_s11  ;;  %v480_v36 = vstv %s4880_s26  ;;  %v4930_v37 = vadd.f32 %v425_v18, %v421_v21  ;;  %s4995_s11 = sld [smem:[#allocation7 + $0x600]]  ;;  %s5002_s26 = sld [smem:[#allocation7 + $0x601]] }
  0x91   : > { %405 = vrot.lane.b32.xlu1 %v4892_v12, %s4559_s27  ;;  %v453_v38 = vmul.f32 %v4793_v8, %v452_v24  ;;  %v476_v39 = vmul.f32 %v4789_v5, %v474_v35  ;;  %v471_v40 = vmul.f32 %v470_v30, %v4771_v0  ;;  %v449_v41 = vadd.f32 %v447_v26, %v443_v25 }
  0x92   : > { %v482_v42 = vmul.f32 %v4795_v9, %v480_v36  ;;  %v475_v44 = vmul.f32 %v4787_v4, %v474_v35  ;;  %v498_v45 = vstv %s4888_s5  ;;  %v502_v48 = vstv %s4897_s12  ;;  %s5012_s5 = sld [smem:[#allocation7 + $0x602]]  ;;  %s5017_s12 = sld [smem:[#allocation7 + $0x680]] }
  0x93   : > { %403 = vrot.lane.b32.xlu0 %v4917_v27, %s4559_s27  ;;  %v478_v46 = vadd.f32 %v476_v39, %v472_v34  ;;  %v500_v47 = vmul.f32 %v498_v45, %v4773_v1  ;;  %v508_v49 = vstv %s4899_s14  ;;  %v4951_v51 = vadd.f32 %v454_v29, %v450_v33  ;;  %s5019_s14 = sld [smem:[#allocation7 + $0x681]] }
  0x94   : > { %v481_v52 = vmul.f32 %v4793_v8, %v480_v36  ;;  %v504_v53 = vmul.f32 %v4789_v5, %v502_v48  ;;  %v477_v56 = vadd.f32 %v475_v44, %v471_v40  ;;  %v499_v57 = vmul.f32 %v498_v45, %v4771_v0 }
  0x95   : > { %433 = vrot.lane.b32.xlu1 %v4919_v28, %s4559_s27  ;;  %v503_v58 = vmul.f32 %v4787_v4, %v502_v48  ;;  %v526_v59 = vstv %s4909_s25  ;;  %v510_v61 = vmul.f32 %v4795_v9, %v508_v49  ;;  %v530_v62 = vstv %s4913_s30  ;;  %s5029_s25 = sld [smem:[#allocation7 + $0x682]]  ;;  %s5040_s30 = sld [smem:[#allocation7 + $0x700]] }
  0x96   : > { %v506_v60 = vadd.f32 %v504_v53, %v500_v47  ;;  %v4968_v63 = vadd.f32 %v453_v38, %v449_v41  ;;  %v4970_v10 = vadd.f32 %v482_v42, %v478_v46  ;;  %v528_v11 = vmul.f32 %v526_v59, %v4773_v1 }
  0x97   : > { %431 = vrot.lane.b32.xlu0 %v4930_v37, %s4559_s27  ;;  %v532_v13 = vmul.f32 %v4789_v5, %v530_v62  ;;  %v509_v15 = vmul.f32 %v4793_v8, %v508_v49  ;;  %v536_v16 = vstv %s4928_s10  ;;  %v527_v17 = vmul.f32 %v526_v59, %v4771_v0  ;;  %s5046_s10 = sld [smem:[#allocation7 + $0x701]] }
  0x98   : > { %v531_v18 = vmul.f32 %v4787_v4, %v530_v62  ;;  %v4986_v19 = vadd.f32 %v481_v52, %v477_v56  ;;  %v505_v20 = vadd.f32 %v503_v58, %v499_v57  ;;  %v554_v21 = vstv %s4935_s23  ;;  %s5054_s23 = sld [smem:[#allocation7 + $0x702]] }
  0x99   : > { %461 = vrot.lane.b32.xlu1 %v4951_v51, %s4559_s27  ;;  %v558_v22 = vstv %s4937_s13  ;;  %v4990_v23 = vadd.f32 %v510_v61, %v506_v60  ;;  %v556_v24 = vmul.f32 %v554_v21, %v4773_v1  ;;  %v564_v26 = vstv %s4942_s8  ;;  %s5067_s13 = sld [smem:[#allocation7 + $0x780]]  ;;  %s5074_s8 = sld [smem:[#allocation7 + $0x781]] }
  0x9a   : > { %v560_v25 = vmul.f32 %v4789_v5, %v558_v22  ;;  %v534_v29 = vadd.f32 %v532_v13, %v528_v11  ;;  %v538_v30 = vmul.f32 %v4795_v9, %v536_v16  ;;  %v555_v33 = vmul.f32 %v554_v21, %v4771_v0 }
  0x9b   : > { %459 = vrot.lane.b32.xlu0 %v4968_v63, %s4559_s27  ;;  %v559_v34 = vmul.f32 %v4787_v4, %v558_v22  ;;  %v533_v35 = vadd.f32 %v531_v18, %v527_v17  ;;  %v537_v36 = vmul.f32 %v4793_v8, %v536_v16  ;;  %v566_v38 = vmul.f32 %v4795_v9, %v564_v26 }
  0x9c   : > { %v582_v39 = vstv %s4955_s28  ;;  %v562_v40 = vadd.f32 %v560_v25, %v556_v24  ;;  %v586_v42 = vstv %s4960_s24  ;;  %v592_v44 = vstv %s4962_s1  ;;  %s5086_s28 = sld [smem:[#allocation7 + $0x782]] }
  0x9d   : > { %489 = vrot.lane.b32.xlu1 %v4970_v10, %s4559_s27  ;;  %v584_v41 = vmul.f32 %v582_v39, %v4773_v1  ;;  %v561_v45 = vadd.f32 %v559_v34, %v555_v33  ;;  %v565_v46 = vmul.f32 %v4793_v8, %v564_v26  ;;  %v588_v47 = vmul.f32 %v4789_v5, %v586_v42 }
  0x9e   : > { %v583_v48 = vmul.f32 %v582_v39, %v4771_v0  ;;  %v5023_v49 = vadd.f32 %v509_v15, %v505_v20  ;;  %v5025_v52 = vadd.f32 %v538_v30, %v534_v29  ;;  %v594_v53 = vmul.f32 %v4795_v9, %v592_v44 }
  0x9f   : > { %487 = vrot.lane.b32.xlu0 %v4986_v19, %s4559_s27  ;;  %v587_v56 = vmul.f32 %v4787_v4, %v586_v42  ;;  %v590_v57 = vadd.f32 %v588_v47, %v584_v41  ;;  %v610_v58 = vstv %s4974_s7  ;;  %v614_v59 = vstv %s4982_s21 }
  0xa0   : > { %v620_v60 = vstv %s4984_s29  ;;  %v5036_v61 = vadd.f32 %v537_v36, %v533_v35  ;;  %v5038_v62 = vadd.f32 %v566_v38, %v562_v40  ;;  %v5042_v11 = vadd.f32 %v565_v46, %v561_v45 }
  0xa1   : > { %517 = vrot.lane.b32.xlu1 %v4990_v23, %s4559_s27  ;;  %v589_v13 = vadd.f32 %v587_v56, %v583_v48  ;;  %v593_v15 = vmul.f32 %v4793_v8, %v592_v44  ;;  %v638_v16 = vstv %s4995_s11  ;;  %v612_v17 = vmul.f32 %v610_v58, %v4773_v1 }
  0xa2   : > { %v616_v18 = vmul.f32 %v4789_v5, %v614_v59  ;;  %v622_v20 = vmul.f32 %v4795_v9, %v620_v60  ;;  %v642_v21 = vstv %s5002_s26  ;;  %v5058_v22 = vadd.f32 %v594_v53, %v590_v57 }
  0xa3   : > { %515 = vrot.lane.b32.xlu0 %v5023_v49, %s4559_s27  ;;  %v611_v24 = vmul.f32 %v610_v58, %v4771_v0  ;;  %v615_v25 = vmul.f32 %v4787_v4, %v614_v59  ;;  %v640_v26 = vmul.f32 %v638_v16, %v4773_v1  ;;  %v644_v29 = vmul.f32 %v4789_v5, %v642_v21 }
  0xa4   : > { %v648_v30 = vstv %s5012_s5  ;;  %v639_v33 = vmul.f32 %v638_v16, %v4771_v0  ;;  %v643_v34 = vmul.f32 %v4787_v4, %v642_v21  ;;  %v5069_v35 = vadd.f32 %v593_v15, %v589_v13 }
  0xa5   : > { %545 = vrot.lane.b32.xlu1 %v5025_v52, %s4559_s27  ;;  %v621_v36 = vmul.f32 %v4793_v8, %v620_v60  ;;  %v666_v38 = vstv %s5017_s12  ;;  %v670_v39 = vstv %s5019_s14  ;;  %v618_v40 = vadd.f32 %v616_v18, %v612_v17 }
  0xa6   : > { %v668_v41 = vmul.f32 %v666_v38, %v4773_v1  ;;  %v672_v42 = vmul.f32 %v4789_v5, %v670_v39  ;;  %v676_v44 = vstv %s5029_s25  ;;  %v617_v45 = vadd.f32 %v615_v25, %v611_v24 }
  0xa7   : > { %543 = vrot.lane.b32.xlu0 %v5036_v61, %s4559_s27  ;;  %v650_v46 = vmul.f32 %v4795_v9, %v648_v30  ;;  %v667_v47 = vmul.f32 %v666_v38, %v4771_v0  ;;  %v671_v48 = vmul.f32 %v4787_v4, %v670_v39  ;;  %v646_v53 = vadd.f32 %v644_v29, %v640_v26  ;;  %v783_v26 = vld [vmem:[#allocation8 + $0x10] sm:$0xff]  ;;  %v784_v38 = vld [vmem:[#allocation8 + $0x18] sm:$0xff]  ;;  %v785_v39 = vld [vmem:[#allocation8 + $0x20] sm:$0xff] }
  0xa8   : > { %v645_v56 = vadd.f32 %v643_v34, %v639_v33  ;;  %v649_v57 = vmul.f32 %v4793_v8, %v648_v30  ;;  %v694_v58 = vstv %s5040_s30  ;;  %v674_v59 = vadd.f32 %v672_v42, %v668_v41 }
  0xa9   : > { %573 = vrot.lane.b32.xlu1 %v5038_v62, %s4559_s27  ;;  %v678_v60 = vmul.f32 %v4795_v9, %v676_v44  ;;  %v677_v13 = vmul.f32 %v4793_v8, %v676_v44  ;;  %v698_v15 = vstv %s5046_s10  ;;  %v673_v16 = vadd.f32 %v671_v48, %v667_v47  ;;  %v5115_v44 = vld [vmem:[#allocation8 + $0x30] sm:$0xff] }
  0xaa   : > { %v696_v17 = vmul.f32 %v694_v58, %v4773_v1  ;;  %v700_v18 = vmul.f32 %v4789_v5, %v698_v15  ;;  %v704_v21 = vstv %s5054_s23  ;;  %v5100_v24 = vadd.f32 %v622_v20, %v618_v40  ;;  %s4561_s23 = smov 96  }
  0xab   : > { %571 = vrot.lane.b32.xlu0 %v5042_v11, %s4559_s27  ;;  %v5102_v25 = vadd.f32 %v621_v36, %v617_v45  ;;  %v5104_v29 = vadd.f32 %v650_v46, %v646_v53  ;;  %v695_v30 = vmul.f32 %v694_v58, %v4771_v0  ;;  %v699_v33 = vmul.f32 %v4787_v4, %v698_v15  ;;  %v786_v36 = vld [vmem:[#allocation8 + $0x28] sm:$0xff]  ;;  %v5122_v53 = vld [vmem:[#allocation8 + $0x38] sm:$0xff] }
  0xac   : > { %v722_v34 = vstv %s5067_s13  ;;  %v5109_v41 = vadd.f32 %v649_v57, %v645_v56  ;;  %v5111_v42 = vadd.f32 %v678_v60, %v674_v59  ;;  %v706_v20 = vmul.f32 %v4795_v9, %v704_v21  ;;  %s3342_s13 = sshll.u32 %s4755_s3, 8 }
  0xad   : > { %601 = vrot.lane.b32.xlu1 %v5058_v22, %s4559_s27  ;;  %6149 = vst [vmem:[#allocation24_spill] sm:$0xff] %v5102_v25  ;;  %6150 = vst [vmem:[#allocation25_spill] sm:$0xff] %v5104_v29  ;;  %v726_v40 = vstv %s5074_s8  ;;  %v5119_v45 = vadd.f32 %v677_v13, %v673_v16  ;;  %v702_v46 = vadd.f32 %v700_v18, %v696_v17  ;;  %v892_v48 = vand.u32 4294901760, %v783_v26  ;;  %s5927_s8 = scalar_lea.vmem [#allocation10], %s3342_s13 }
  0xae   : > { %6151 = vst [vmem:[#allocation26_spill] sm:$0xff] %v5109_v41  ;;  %v705_v47 = vmul.f32 %v4793_v8, %v704_v21  ;;  %v724_v56 = vmul.f32 %v722_v34, %v4773_v1  ;;  %v732_v57 = vstv %s5086_s28  ;;  %v895_v58 = vand.u32 4294901760, %v784_v38  ;;  %s3173_s28 = scalar_lea.sflag [#allocation5], %s4755_s3 }
  0xaf   : > { %599 = vrot.lane.b32.xlu0 %v5069_v35, %s4559_s27  ;;  %v898_v59 = vand.u32 4294901760, %v785_v39  ;;  %v701_v60 = vadd.f32 %v699_v33, %v695_v30  ;;  %v728_v15 = vmul.f32 %v4789_v5, %v726_v40  ;;  %v901_v7 = vand.u32 4294901760, %v786_v36 }
  0xb0   : > { %v6105_v13 = vand.u32 4294901760, %v5115_v44  ;;  %v5130_v16 = vpack.c.bf16 %v895_v58, %v892_v48  ;;  %v5136_v18 = vsub.f32 %v4783_v2, %v886_v6  ;;  %v6153_v1 = vand.u32 4294901760, %v4785_v3 }
  0xb1   : > { %629 = vrot.lane.b32.xlu1 %v5100_v24, %s4559_s27  ;;  %v734_v5 = vmul.f32 %v4795_v9, %v732_v57  ;;  %v723_v30 = vmul.f32 %v722_v34, %v4771_v0  ;;  %v5147_v33 = vpack.c.bf16 %v901_v7, %v898_v59  ;;  %v5149_v17 = vsub.f32 %v783_v26, %v892_v48 }
  0xb2   : > { %6152 = vst [vmem:[#allocation27_spill] sm:$0xff] %v5130_v16  ;;  %v5141_v21 = vsub.f32 %v4785_v3, %v6153_v1  ;;  %4093 = vmatprep.subr.bf16.mxu0 %v5130_v16  ;;  %v1281_v2 = vand.u32 4294901760, %v5136_v18  ;;  %v5156_v6 = vsub.f32 %v784_v38, %v895_v58  ;;  %v5158_v1 = vsub.f32 %v785_v39, %v898_v59 }
  0xb3   : > { %627 = vrot.lane.b32.xlu0 %v5102_v25, %s4559_s27  ;;  %v5160_v9 = vadd.f32 %v706_v20, %v702_v46  ;;  %v727_v0 = vmul.f32 %v4787_v4, %v726_v40  ;;  %4095 = vmatpush3.bf16.msra.mxu0 %v5130_v16  ;;  %v1295_v26 = vand.u32 4294901760, %v5149_v17  ;;  %v1315_v34 = vsub.f32 %v786_v36, %v901_v7 }
  0xb4   : > { %v1288_v3 = vand.u32 4294901760, %v5141_v21  ;;  %4045 = vmatprep.subr.bf16.mxu1 %v5130_v16  ;;  %4097 = vmatprep.subr.bf16.mxu0 %v5147_v33  ;;  %v6154_v38 = vand.u32 4294901760, %v5122_v53  ;;  %v1282_v20 = vsub.f32 %v5136_v18, %v1281_v2  ;;  %v1302_v40 = vand.u32 4294901760, %v5156_v6 }
  0xb5   : > { %657 = vrot.lane.b32.xlu1 %v5104_v29, %s4559_s27  ;;  %4047 = vmatpush3.bf16.msra.mxu1 %v5130_v16  ;;  %v730_v7 = vadd.f32 %v728_v15, %v724_v56  ;;  %v1296_v36 = vsub.f32 %v5149_v17, %v1295_v26  ;;  %v1309_v46 = vand.u32 4294901760, %v5158_v1  ;;  %v1316_v48 = vand.u32 4294901760, %v1315_v34 }
  0xb6   : > { %v5172_v39 = vpack.c.bf16 %v6154_v38, %v6105_v13  ;;  %v1289_v4 = vsub.f32 %v5141_v21, %v1288_v3  ;;  %4049 = vmatprep.subr.bf16.mxu1 %v5147_v33  ;;  %v1283_v58 = vand.u32 4294901760, %v1282_v20  ;;  %v1303_v38 = vsub.f32 %v5156_v6, %v1302_v40 }
  0xb7   : > { %655 = vrot.lane.b32.xlu0 %v5109_v41, %s4559_s27  ;;  %v5185_v13 = vpack.c.bf16 %v1302_v40, %v1295_v26  ;;  %4099 = vmatpush3.bf16.msra.mxu0 %v5147_v33  ;;  %v1297_v16 = vand.u32 4294901760, %v1296_v36  ;;  %v1310_v56 = vsub.f32 %v5158_v1, %v1309_v46  ;;  %v1317_v15 = vsub.f32 %v1315_v34, %v1316_v48 }
  0xb8   : > { %v1290_v59 = vand.u32 4294901760, %v1289_v4  ;;  %v5189_v41 = vpack.c.bf16 %v1316_v48, %v1309_v46  ;;  %v5191_v29 = vadd.f32 %v705_v47, %v701_v60  ;;  %v733_v25 = vmul.f32 %v4793_v8, %v732_v57  ;;  %4101 = vmatprep.subr.bf16.mxu0 %v5172_v39 }
  0xb9   : > { %685 = vrot.lane.b32.xlu1 %v5111_v42, %s4559_s27  ;;  %4051 = vmatpush3.bf16.msra.mxu1 %v5147_v33  ;;  %v5196_v20 = vpack.c.bf16 %v1288_v3, %v1281_v2  ;;  %v1304_v26 = vand.u32 4294901760, %v1303_v38  ;;  %v729_v4 = vadd.f32 %v727_v0, %v723_v30  ;;  %v1311_v36 = vand.u32 4294901760, %v1310_v56 }
  0xba   : > { %4053 = vmatprep.subr.bf16.mxu1 %v5172_v39  ;;  %v5201_v40 = vpack.c.bf16 %v1290_v59, %v1283_v58  ;;  %v1318_v47 = vand.u32 4294901760, %v1317_v15  ;;  %v5205_v8 = vadd.f32 %v734_v5, %v730_v7  ;;  %v6156_v2 = vand.u32 4294901760, %v5122_v53 }
  0xbb   : > { %683 = vrot.lane.b32.xlu0 %v5119_v45, %s4559_s27  ;;  %v5207_v57 = vpack.c.bf16 %v1304_v26, %v1297_v16  ;;  %4103 = vmatpush3.bf16.msra.mxu0 %v5172_v39  ;;  %v5216_v30 = vadd.f32 %v733_v25, %v729_v4  ;;  %v6155_v16 = vand.u32 4294901760, %v5115_v44  ;;  %v5242_v56 = vpack.c.bf16 %v1315_v34, %v5158_v1 }
  0xbc   : > { %v5210_v60 = vpack.c.bf16 %v1318_v47, %v1311_v36  ;;  %4105 = vmatprep.subr.bf16.mxu0 %v5196_v20  ;;  %v1329_v3 = vsub.f32 %v5122_v53, %v6156_v2  ;;  %v5239_v53 = vpack.c.bf16 %v5156_v6, %v5149_v17 }
  0xbd   : > { %713 = vrot.lane.b32.xlu1 %v5160_v9, %s4559_s27  ;;  %4055 = vmatpush3.bf16.msra.mxu1 %v5172_v39  ;;  %v1322_v5 = vsub.f32 %v5115_v44, %v6155_v16  ;;  %v5235_v44 = vpack.c.bf16 %v5141_v21, %v5136_v18 }
  0xbe   : > { %4057 = vmatprep.subr.bf16.mxu1 %v5201_v40  ;;  %v1330_v7 = vand.u32 4294901760, %v1329_v3 }
  0xbf   : > { %711 = vrot.lane.b32.xlu0 %v5191_v29, %s4559_s27  ;;  %v1323_v0 = vand.u32 4294901760, %v1322_v5  ;;  %v5253_v34 = vpack.c.bf16 %v1329_v3, %v1322_v5 }
  0xc0   : > { %v1331_v46 = vsub.f32 %v1329_v3, %v1330_v7 }
  0xc1   : > { %741 = vrot.lane.b32.xlu1 %v5205_v8, %s4559_s27  ;;  %v1324_v25 = vsub.f32 %v1322_v5, %v1323_v0  ;;  %v5229_v48 = vpack.c.bf16 %v1330_v7, %v1323_v0 }
  0xc2   : > { %v1332_v59 = vand.u32 4294901760, %v1331_v46 }
  0xc3   : > { %739 = vrot.lane.b32.xlu0 %v5216_v30, %s4559_s27  ;;  %v1325_v58 = vand.u32 4294901760, %v1324_v25 }
  0xc5   : > { %v5231_v38 = vpack.c.bf16 %v1332_v59, %v1325_v58 }
  0xf7   : > { %v348_v15 = vpop.permute.xlu1 %347 }
  0xf8   : > { %v353_v26 = vmax.f32 %v4835_v31, %v348_v15 }
  0xf9   : > { %v319_v4 = vpop.permute.xlu0 %318 }
  0xfa   : > { %355 = vst.msk [vmem:[#allocation2 + $0x10] sm:$0xff] %vm326_vm0, %v353_v26  ;;  %v324_v36 = vmax.f32 %v4853_v43, %v319_v4 }
  0xfb   : > { %v350_v47 = vpop.permute.xlu1 %349 }
  0xfc   : > { %v354_v18 = vmax.f32 %v4837_v32, %v350_v47  ;;  %327 = vst.msk [vmem:[#allocation2] sm:$0xff] %vm326_vm0, %v324_v36 }
  0xfd   : > { %v321_v17 = vpop.permute.xlu0 %320 }
  0xfe   : > { %356 = vst.msk [vmem:[#allocation2 + $0x18] sm:$0xff] %vm326_vm0, %v354_v18  ;;  %v325_v21 = vmax.f32 %v4863_v50, %v321_v17 }
  0xff   : > { %v378_v6 = vpop.permute.xlu1 %377 }
 0x100   : > { %v382_v1 = vmax.f32 %v4872_v54, %v378_v6  ;;  %328 = vst.msk [vmem:[#allocation2 + $0x8] sm:$0xff] %vm326_vm0, %v325_v21 }
 0x101   : > { %v751_v31 = vld [vmem:[#allocation2 + $0x10] sm:$0xff]  ;;  %v376_v43 = vpop.permute.xlu0 %375 }
 0x102   : > { %384 = vst.msk [vmem:[#allocation2 + $0x28] sm:$0xff] %vm326_vm0, %v382_v1  ;;  %v796_v32 = vsel %vm326_vm0, %v751_v31, 0  ;;  %v381_v16 = vmax.f32 %v4874_v55, %v376_v43 }
 0x103   : > { %v406_v2 = vpop.permute.xlu1 %405  ;;  %v5258_v0 = vand.u32 4294901760, %v796_v32  ;;  %v749_v7 = vld [vmem:[#allocation2] sm:$0xff] }
 0x104   : > { %v410_v50 = vmax.f32 %v4892_v12, %v406_v2  ;;  %383 = vst.msk [vmem:[#allocation2 + $0x20] sm:$0xff] %vm326_vm0, %v381_v16  ;;  %v790_v54 = vsel %vm326_vm0, %v749_v7, 0 }
 0x105   : > { %v752_v25 = vld [vmem:[#allocation2 + $0x18] sm:$0xff]  ;;  %v404_v5 = vpop.permute.xlu0 %403  ;;  %v5264_v3 = vand.u32 4294901760, %v790_v54  ;;  %v5269_v59 = vsub.f32 %v796_v32, %v5258_v0 }
 0x106   : > { %412 = vst.msk [vmem:[#allocation2 + $0x38] sm:$0xff] %vm326_vm0, %v410_v50  ;;  %v799_v46 = vsel %vm326_vm0, %v752_v25, 0  ;;  %v409_v55 = vmax.f32 %v4917_v27, %v404_v5 }
 0x107   : > { %v434_v58 = vpop.permute.xlu1 %433  ;;  %v5271_v12 = vand.u32 4294901760, %v799_v46  ;;  %v5275_v26 = vsub.f32 %v790_v54, %v5264_v3  ;;  %v750_v4 = vld [vmem:[#allocation2 + $0x8] sm:$0xff]  ;;  %v980_v31 = vand.u32 4294901760, %v5269_v59 }
 0x108   : > { %v438_v15 = vmax.f32 %v4919_v28, %v434_v58  ;;  %411 = vst.msk [vmem:[#allocation2 + $0x30] sm:$0xff] %vm326_vm0, %v409_v55  ;;  %v793_v36 = vsel %vm326_vm0, %v750_v4, 0 }
 0x109   : > { %v5280_v47 = vsub.f32 %v799_v46, %v5271_v12  ;;  %v754_v27 = vld [vmem:[#allocation2 + $0x28] sm:$0xff]  ;;  %v432_v18 = vpop.permute.xlu0 %431  ;;  %v960_v17 = vand.u32 4294901760, %v5275_v26  ;;  %v5284_v21 = vand.u32 4294901760, %v793_v36 }
 0x10a   : > { %440 = vst.msk [vmem:[#allocation2 + $0x48] sm:$0xff] %vm326_vm0, %v438_v15  ;;  %v805_v28 = vsel %vm326_vm0, %v754_v27, 0  ;;  %v437_v6 = vmax.f32 %v4930_v37, %v432_v18 }
 0x10b   : > { %v462_v1 = vpop.permute.xlu1 %461  ;;  %v5289_v43 = vand.u32 4294901760, %v805_v28  ;;  %3864 = vmatprep.mubr.f32.mxu0 %v960_v17  ;;  %v961_v16 = vsub.f32 %v5275_v26, %v960_v17  ;;  %v5294_v2 = vsub.f32 %v793_v36, %v5284_v21  ;;  %v753_v50 = vld [vmem:[#allocation2 + $0x20] sm:$0xff]  ;;  %v990_v7 = vand.u32 4294901760, %v5280_v47 }
 0x10c   : > { %v466_v32 = vmax.f32 %v4951_v51, %v462_v1  ;;  %439 = vst.msk [vmem:[#allocation2 + $0x40] sm:$0xff] %vm326_vm0, %v437_v6  ;;  %v802_v37 = vsel %vm326_vm0, %v753_v50, 0  ;;  %v981_v36 = vsub.f32 %v5269_v59, %v980_v31 }
 0x10d   : > { %v5300_v54 = vsub.f32 %v805_v28, %v5289_v43  ;;  %v756_v25 = vld [vmem:[#allocation2 + $0x38] sm:$0xff]  ;;  %v460_v5 = vpop.permute.xlu0 %459  ;;  %v962_v51 = vand.u32 4294901760, %v961_v16  ;;  %v970_v46 = vand.u32 4294901760, %v5294_v2  ;;  %v5304_v55 = vand.u32 4294901760, %v802_v37 }
 0x10e   : > { %468 = vst.msk [vmem:[#allocation2 + $0x58] sm:$0xff] %vm326_vm0, %v466_v32  ;;  %v811_v58 = vsel %vm326_vm0, %v756_v25, 0  ;;  %v465_v15 = vmax.f32 %v4968_v63, %v460_v5  ;;  %v991_v63 = vsub.f32 %v5280_v47, %v990_v7 }
 0x10f   : > { %v490_v4 = vpop.permute.xlu1 %489  ;;  %v1010_v27 = vand.u32 4294901760, %v5300_v54  ;;  %v5310_v18 = vand.u32 4294901760, %v811_v58  ;;  %3672 = vmatprep.mubr.f32.mxu1 %v962_v51  ;;  %3865 = vmatmul.mubr.f32.vlgmr.msra.gmra.mrb[0].mxu0 %v970_v46  ;;  %v971_v28 = vsub.f32 %v5294_v2, %v970_v46  ;;  %v5315_v6 = vsub.f32 %v802_v37, %v5304_v55  ;;  %v755_v1 = vld [vmem:[#allocation2 + $0x30] sm:$0xff] }
 0x110   : > { %v494_v17 = vmax.f32 %v4970_v10, %v490_v4  ;;  %467 = vst.msk [vmem:[#allocation2 + $0x50] sm:$0xff] %vm326_vm0, %v465_v15  ;;  %3867 = vmatprep.mubr.f32.mxu0 %v980_v31  ;;  %4107 = vmatpush3.bf16.msra.mxu0 %v5196_v20  ;;  %v808_v32 = vsel %vm326_vm0, %v755_v1, 0  ;;  %v982_v51 = vand.u32 4294901760, %v981_v36 }
 0x111   : > { %v5322_v16 = vsub.f32 %v811_v58, %v5310_v18  ;;  %v758_v50 = vld [vmem:[#allocation2 + $0x48] sm:$0xff]  ;;  %v488_v10 = vpop.permute.xlu0 %487  ;;  %v972_v25 = vand.u32 4294901760, %v971_v28  ;;  %v1000_v37 = vand.u32 4294901760, %v5315_v6  ;;  %v5326_v5 = vand.u32 4294901760, %v808_v32  ;;  %4109 = vmatprep.subr.bf16.mxu0 %v5185_v13 }
 0x112   : > { %496 = vst.msk [vmem:[#allocation2 + $0x68] sm:$0xff] %vm326_vm0, %v494_v17  ;;  %v817_v31 = vsel %vm326_vm0, %v758_v50, 0  ;;  %v493_v20 = vmax.f32 %v4986_v19, %v488_v10  ;;  %v1011_v58 = vsub.f32 %v5300_v54, %v1010_v27  ;;  %v992_v19 = vand.u32 4294901760, %v991_v63 }
 0x113   : > { %6157 = vst [vmem:[#allocation28_spill] sm:$0xff] %v5322_v16  ;;  %v518_v46 = vpop.permute.xlu1 %517  ;;  %v5332_v15 = vand.u32 4294901760, %v817_v31  ;;  %3673 = vmatmul.mubr.f32.vlgmr.msra.gmra.mrb[0].mxu1 %v972_v25  ;;  %3868 = vmatmul.mubr.f32.gmra.mrb[2].mxu0 %v990_v7  ;;  %v1001_v17 = vsub.f32 %v5315_v6, %v1000_v37  ;;  %v5337_v28 = vsub.f32 %v808_v32, %v5326_v5  ;;  %v757_v1 = vld [vmem:[#allocation2 + $0x40] sm:$0xff]  ;;  %v1030_v36 = vand.u32 4294901760, %v5322_v16 }
 0x114   : > { %v522_v4 = vmax.f32 %v4990_v23, %v518_v46  ;;  %495 = vst.msk [vmem:[#allocation2 + $0x60] sm:$0xff] %vm326_vm0, %v493_v20  ;;  %4059 = vmatpush3.bf16.msra.mxu1 %v5201_v40  ;;  %3675 = vmatprep.mubr.f32.mxu1 %v982_v51  ;;  %v814_v50 = vsel %vm326_vm0, %v757_v1, 0 }
 0x115   : > { %6158 = vst [vmem:[#allocation29_spill] sm:$0xff] %v5337_v28  ;;  %v5344_v7 = vsub.f32 %v817_v31, %v5332_v15  ;;  %v760_v23 = vld [vmem:[#allocation2 + $0x58] sm:$0xff]  ;;  %3870 = vmatprep.mubr.f32.mxu0 %v1000_v37  ;;  %v516_v32 = vpop.permute.xlu0 %515  ;;  %v1002_v10 = vand.u32 4294901760, %v1001_v17  ;;  %v1020_v25 = vand.u32 4294901760, %v5337_v28  ;;  %v5348_v20 = vand.u32 4294901760, %v814_v50  ;;  %4061 = vmatprep.subr.bf16.mxu1 %v5207_v57 }
 0x116   : > { %524 = vst.msk [vmem:[#allocation2 + $0x78] sm:$0xff] %vm326_vm0, %v522_v4  ;;  %v823_v40 = vsel %vm326_vm0, %v760_v23, 0  ;;  %v521_v63 = vmax.f32 %v5023_v49, %v516_v32  ;;  %4111 = vmatpush3.bf16.msra.mxu0 %v5185_v13  ;;  %v1012_v31 = vand.u32 4294901760, %v1011_v58  ;;  %v1031_v49 = vsub.f32 %v5322_v16, %v1030_v36 }
 0x117   : > { %6159 = vst [vmem:[#allocation30_spill] sm:$0xff] %v5344_v7  ;;  %v546_v51 = vpop.permute.xlu1 %545  ;;  %v5353_v46 = vand.u32 4294901760, %v823_v40  ;;  %3676 = vmatmul.mubr.f32.gmra.mrb[2].mxu1 %v992_v19  ;;  %3871 = vmatmul.mubr.f32.gmra.mrb[4].mxu0 %v1010_v27  ;;  %v1021_v4 = vsub.f32 %v5337_v28, %v1020_v25  ;;  %v5359_v17 = vsub.f32 %v814_v50, %v5348_v20  ;;  %v759_v1 = vld [vmem:[#allocation2 + $0x50] sm:$0xff]  ;;  %v1050_v23 = vand.u32 4294901760, %v5344_v7 }
 0x118   : > { %v550_v37 = vmax.f32 %v5025_v52, %v546_v51  ;;  %523 = vst.msk [vmem:[#allocation2 + $0x70] sm:$0xff] %vm326_vm0, %v521_v63  ;;  %3678 = vmatprep.mubr.f32.mxu1 %v1002_v10  ;;  %3873 = vmatprep.mubr.f32.mxu0 %v1020_v25  ;;  %v820_v13 = vsel %vm326_vm0, %v759_v1, 0 }
 0x119   : > { %6160 = vst [vmem:[#allocation31_spill] sm:$0xff] %v5359_v17  ;;  %v5366_v27 = vsub.f32 %v823_v40, %v5353_v46  ;;  %v762_v52 = vld [vmem:[#allocation2 + $0x68] sm:$0xff]  ;;  %v544_v58 = vpop.permute.xlu0 %543  ;;  %v1022_v19 = vand.u32 4294901760, %v1021_v4  ;;  %v1040_v50 = vand.u32 4294901760, %v5359_v17  ;;  %v5370_v32 = vand.u32 4294901760, %v820_v13  ;;  %4063 = vmatpush3.bf16.msra.mxu1 %v5207_v57  ;;  %4113 = vmatprep.subr.bf16.mxu0 %v5189_v41 }
 0x11a   : > { %552 = vst.msk [vmem:[#allocation2 + $0x88] sm:$0xff] %vm326_vm0, %v550_v37  ;;  %v829_v10 = vsel %vm326_vm0, %v762_v52, 0  ;;  %v549_v25 = vmax.f32 %v5036_v61, %v544_v58  ;;  %4065 = vmatprep.subr.bf16.mxu1 %v5210_v60  ;;  %4115 = vmatpush3.bf16.msra.mxu0 %v5189_v41  ;;  %v1032_v61 = vand.u32 4294901760, %v1031_v49  ;;  %v1051_v52 = vsub.f32 %v5344_v7, %v1050_v23 }
 0x11b   : > { %6161 = vst [vmem:[#allocation32_spill] sm:$0xff] %v5366_v27  ;;  %v574_v63 = vpop.permute.xlu1 %573  ;;  %v1070_v40 = vand.u32 4294901760, %v5366_v27  ;;  %v5377_v51 = vand.u32 4294901760, %v829_v10  ;;  %3679 = vmatmul.mubr.f32.gmra.mrb[4].mxu1 %v1012_v31  ;;  %3874 = vmatmul.mubr.f32.gmra.mrb[6].mxu0 %v1030_v36  ;;  %v1041_v57 = vsub.f32 %v5359_v17, %v1040_v50  ;;  %v5384_v4 = vsub.f32 %v820_v13, %v5370_v32  ;;  %v761_v1 = vld [vmem:[#allocation2 + $0x60] sm:$0xff] }
 0x11c   : > { %v578_v37 = vmax.f32 %v5038_v62, %v574_v63  ;;  %551 = vst.msk [vmem:[#allocation2 + $0x80] sm:$0xff] %vm326_vm0, %v549_v25  ;;  %3681 = vmatprep.mubr.f32.mxu1 %v1022_v19  ;;  %3876 = vmatprep.mubr.f32.mxu0 %v1040_v50  ;;  %v826_v58 = vsel %vm326_vm0, %v761_v1, 0 }
 0x11d   : > { %6162 = vst [vmem:[#allocation33_spill] sm:$0xff] %v5384_v4  ;;  %v5390_v41 = vsub.f32 %v829_v10, %v5377_v51  ;;  %v764_v36 = vld [vmem:[#allocation2 + $0x78] sm:$0xff]  ;;  %v572_v62 = vpop.permute.xlu0 %571  ;;  %v1042_v31 = vand.u32 4294901760, %v1041_v57  ;;  %v1060_v13 = vand.u32 4294901760, %v5384_v4  ;;  %v5394_v63 = vand.u32 4294901760, %v826_v58  ;;  %4067 = vmatpush3.bf16.msra.mxu1 %v5210_v60  ;;  %4117 = vmatprep.subr.bf16.mxu0 %v5229_v48 }
 0x11e   : > { %580 = vst.msk [vmem:[#allocation2 + $0x98] sm:$0xff] %vm326_vm0, %v578_v37  ;;  %v835_v19 = vsel %vm326_vm0, %v764_v36, 0  ;;  %v577_v49 = vmax.f32 %v5042_v11, %v572_v62  ;;  %v1071_v10 = vsub.f32 %v5366_v27, %v1070_v40  ;;  %4069 = vmatprep.subr.bf16.mxu1 %v5231_v38  ;;  %4119 = vmatpush3.bf16.msra.mxu0 %v5229_v48  ;;  %v1052_v11 = vand.u32 4294901760, %v1051_v52 }
 0x11f   : > { %6163 = vst [vmem:[#allocation34_spill] sm:$0xff] %v5390_v41  ;;  %v602_v50 = vpop.permute.xlu1 %601  ;;  %v5401_v25 = vand.u32 4294901760, %v835_v19  ;;  %3682 = vmatmul.mubr.f32.gmra.mrb[6].mxu1 %v1032_v61  ;;  %3877 = vmatmul.mubr.f32.gmra.mrb[8].mxu0 %v1050_v23  ;;  %v1061_v57 = vsub.f32 %v5384_v4, %v1060_v13  ;;  %v5408_v60 = vsub.f32 %v826_v58, %v5394_v63  ;;  %v763_v1 = vld [vmem:[#allocation2 + $0x70] sm:$0xff]  ;;  %v1090_v36 = vand.u32 4294901760, %v5390_v41 }
 0x120   : > { %v606_v37 = vmax.f32 %v5058_v22, %v602_v50  ;;  %579 = vst.msk [vmem:[#allocation2 + $0x90] sm:$0xff] %vm326_vm0, %v577_v49  ;;  %3684 = vmatprep.mubr.f32.mxu1 %v1042_v31  ;;  %3879 = vmatprep.mubr.f32.mxu0 %v1060_v13  ;;  %v832_v62 = vsel %vm326_vm0, %v763_v1, 0 }
 0x121   : > { %6164 = vst [vmem:[#allocation35_spill] sm:$0xff] %v5408_v60  ;;  %v5414_v48 = vsub.f32 %v835_v19, %v5401_v25  ;;  %v766_v23 = vld [vmem:[#allocation2 + $0x88] sm:$0xff]  ;;  %v600_v22 = vpop.permute.xlu0 %599  ;;  %v1062_v61 = vand.u32 4294901760, %v1061_v57  ;;  %v1080_v58 = vand.u32 4294901760, %v5408_v60  ;;  %v5418_v50 = vand.u32 4294901760, %v832_v62  ;;  %4071 = vmatpush3.bf16.msra.mxu1 %v5231_v38  ;;  %4121 = vmatprep.subr.bf16.mxu0 %v4807_v14 }
 0x122   : > { %608 = vst.msk [vmem:[#allocation2 + $0xa8] sm:$0xff] %vm326_vm0, %v606_v37  ;;  %v841_v31 = vsel %vm326_vm0, %v766_v23, 0  ;;  %v605_v52 = vmax.f32 %v5069_v35, %v600_v22  ;;  %4073 = vmatprep.subr.bf16.mxu1 %v5235_v44  ;;  %v1072_v37 = vand.u32 4294901760, %v1071_v10  ;;  %v1091_v35 = vsub.f32 %v5390_v41, %v1090_v36 }
 0x123   : > { %6165 = vst [vmem:[#allocation36_spill] sm:$0xff] %v5414_v48  ;;  %v630_v13 = vpop.permute.xlu1 %629  ;;  %v5424_v19 = vand.u32 4294901760, %v841_v31  ;;  %3685 = vmatmul.mubr.f32.gmra.mrb[8].mxu1 %v1052_v11  ;;  %3880 = vmatmul.mubr.f32.gmra.mrb[10].mxu0 %v1070_v40  ;;  %v1081_v57 = vsub.f32 %v5408_v60, %v1080_v58  ;;  %v5430_v1 = vsub.f32 %v832_v62, %v5418_v50  ;;  %v765_v38 = vld [vmem:[#allocation2 + $0x80] sm:$0xff]  ;;  %v1110_v23 = vand.u32 4294901760, %v5414_v48 }
 0x124   : > { %v634_v49 = vmax.f32 %v5100_v24, %v630_v13  ;;  %607 = vst.msk [vmem:[#allocation2 + $0xa0] sm:$0xff] %vm326_vm0, %v605_v52  ;;  %3687 = vmatprep.mubr.f32.mxu1 %v1062_v61  ;;  %3882 = vmatprep.mubr.f32.mxu0 %v1080_v58  ;;  %v838_v11 = vsel %vm326_vm0, %v765_v38, 0  ;;  %v6168_v58 = vld [vmem:[#allocation24_spill] sm:$0xff] }
 0x125   : > { %6166 = vst [vmem:[#allocation37_spill] sm:$0xff] %v5430_v1  ;;  %v5437_v40 = vsub.f32 %v841_v31, %v5424_v19  ;;  %v768_v24 = vld [vmem:[#allocation2 + $0x98] sm:$0xff]  ;;  %v628_v10 = vpop.permute.xlu0 %627  ;;  %v1082_v62 = vand.u32 4294901760, %v1081_v57  ;;  %v1100_v22 = vand.u32 4294901760, %v5430_v1  ;;  %v5441_v13 = vand.u32 4294901760, %v838_v11  ;;  %v6169_v31 = vld [vmem:[#allocation25_spill] sm:$0xff] }
 0x126   : > { %636 = vst.msk [vmem:[#allocation2 + $0xb8] sm:$0xff] %vm326_vm0, %v634_v49  ;;  %v847_v61 = vsel %vm326_vm0, %v768_v24, 0  ;;  %v633_v52 = vmax.f32 %v6168_v58, %v628_v10  ;;  %v1092_v24 = vand.u32 4294901760, %v1091_v35  ;;  %v1111_v10 = vsub.f32 %v5414_v48, %v1110_v23 }
 0x127   : > { %6167 = vst [vmem:[#allocation38_spill] sm:$0xff] %v5437_v40  ;;  %v658_v41 = vpop.permute.xlu1 %657  ;;  %v1130_v60 = vand.u32 4294901760, %v5437_v40  ;;  %v5446_v38 = vand.u32 4294901760, %v847_v61  ;;  %3688 = vmatmul.mubr.f32.gmra.mrb[10].mxu1 %v1072_v37  ;;  %3883 = vmatmul.mubr.f32.gmra.mrb[12].mxu0 %v1090_v36  ;;  %v1101_v49 = vsub.f32 %v5430_v1, %v1100_v22  ;;  %v5451_v57 = vsub.f32 %v838_v11, %v5441_v13  ;;  %v767_v4 = vld [vmem:[#allocation2 + $0x90] sm:$0xff] }
 0x128   : > { %v662_v27 = vmax.f32 %v6169_v31, %v658_v41  ;;  %635 = vst.msk [vmem:[#allocation2 + $0xb0] sm:$0xff] %vm326_vm0, %v633_v52  ;;  %3690 = vmatprep.mubr.f32.mxu1 %v1082_v62  ;;  %3885 = vmatprep.mubr.f32.mxu0 %v1100_v22  ;;  %v844_v58 = vsel %vm326_vm0, %v767_v4, 0  ;;  %v6172_v22 = vld [vmem:[#allocation26_spill] sm:$0xff] }
 0x129   : > { %6170 = vst [vmem:[#allocation24_spill] sm:$0xff] %v5451_v57  ;;  %v5457_v37 = vsub.f32 %v847_v61, %v5446_v38  ;;  %v770_v36 = vld [vmem:[#allocation2 + $0xa8] sm:$0xff]  ;;  %v656_v41 = vpop.permute.xlu0 %655  ;;  %v1102_v31 = vand.u32 4294901760, %v1101_v49  ;;  %v1120_v11 = vand.u32 4294901760, %v5451_v57  ;;  %v5461_v1 = vand.u32 4294901760, %v844_v58 }
 0x12a   : > { %664 = vst.msk [vmem:[#allocation2 + $0xc8] sm:$0xff] %vm326_vm0, %v662_v27  ;;  %v853_v62 = vsel %vm326_vm0, %v770_v36, 0  ;;  %v661_v35 = vmax.f32 %v6172_v22, %v656_v41  ;;  %v1131_v48 = vsub.f32 %v5437_v40, %v1130_v60  ;;  %v1112_v36 = vand.u32 4294901760, %v1111_v10 }
 0x12b   : > { %6171 = vst [vmem:[#allocation25_spill] sm:$0xff] %v5457_v37  ;;  %v686_v52 = vpop.permute.xlu1 %685  ;;  %v5466_v4 = vand.u32 4294901760, %v853_v62  ;;  %3691 = vmatmul.mubr.f32.gmra.mrb[12].mxu1 %v1092_v24  ;;  %3886 = vmatmul.mubr.f32.gmra.mrb[14].mxu0 %v1110_v23  ;;  %v1121_v27 = vsub.f32 %v5451_v57, %v1120_v11  ;;  %v5471_v49 = vsub.f32 %v844_v58, %v5461_v1  ;;  %v769_v7 = vld [vmem:[#allocation2 + $0xa0] sm:$0xff]  ;;  %v1150_v41 = vand.u32 4294901760, %v5457_v37 }
 0x12c   : > { %v690_v61 = vmax.f32 %v5111_v42, %v686_v52  ;;  %663 = vst.msk [vmem:[#allocation2 + $0xc0] sm:$0xff] %vm326_vm0, %v661_v35  ;;  %3693 = vmatprep.mubr.f32.mxu1 %v1102_v31  ;;  %3888 = vmatprep.mubr.f32.mxu0 %v1120_v11  ;;  %v850_v22 = vsel %vm326_vm0, %v769_v7, 0 }
 0x12d   : > { %6173 = vst [vmem:[#allocation26_spill] sm:$0xff] %v5471_v49  ;;  %v5477_v24 = vsub.f32 %v853_v62, %v5466_v4  ;;  %v772_v23 = vld [vmem:[#allocation2 + $0xb8] sm:$0xff]  ;;  %v684_v42 = vpop.permute.xlu0 %683  ;;  %v1122_v52 = vand.u32 4294901760, %v1121_v27  ;;  %v1140_v58 = vand.u32 4294901760, %v5471_v49  ;;  %v5481_v40 = vand.u32 4294901760, %v850_v22 }
 0x12e   : > { %692 = vst.msk [vmem:[#allocation2 + $0xd8] sm:$0xff] %vm326_vm0, %v690_v61  ;;  %v859_v31 = vsel %vm326_vm0, %v772_v23, 0  ;;  %v689_v10 = vmax.f32 %v5119_v45, %v684_v42  ;;  %v1132_v62 = vand.u32 4294901760, %v1131_v48  ;;  %v1151_v45 = vsub.f32 %v5457_v37, %v1150_v41 }
 0x12f   : > { %6174 = vst [vmem:[#allocation39_spill] sm:$0xff] %v5477_v24  ;;  %v714_v11 = vpop.permute.xlu1 %713  ;;  %v5485_v35 = vand.u32 4294901760, %v859_v31  ;;  %3694 = vmatmul.mubr.f32.gmra.mrb[14].mxu1 %v1112_v36  ;;  %3889 = vmatmul.mubr.f32.gmra.mrb[16].mxu0 %v1130_v60  ;;  %v1141_v61 = vsub.f32 %v5471_v49, %v1140_v58  ;;  %v5490_v27 = vsub.f32 %v850_v22, %v5481_v40  ;;  %v771_v57 = vld [vmem:[#allocation2 + $0xb0] sm:$0xff]  ;;  %v1170_v23 = vand.u32 4294901760, %v5477_v24 }
 0x130   : > { %v718_v7 = vmax.f32 %v5160_v9, %v714_v11  ;;  %691 = vst.msk [vmem:[#allocation2 + $0xd0] sm:$0xff] %vm326_vm0, %v689_v10  ;;  %3696 = vmatprep.mubr.f32.mxu1 %v1122_v52  ;;  %3891 = vmatprep.mubr.f32.mxu0 %v1140_v58  ;;  %v856_v36 = vsel %vm326_vm0, %v771_v57, 0 }
 0x131   : > { %6175 = vst [vmem:[#allocation40_spill] sm:$0xff] %v5490_v27  ;;  %v5497_v60 = vsub.f32 %v859_v31, %v5485_v35  ;;  %v774_v9 = vld [vmem:[#allocation2 + $0xc8] sm:$0xff]  ;;  %v712_v48 = vpop.permute.xlu0 %711  ;;  %v1142_v22 = vand.u32 4294901760, %v1141_v61  ;;  %v1160_v42 = vand.u32 4294901760, %v5490_v27  ;;  %v5501_v11 = vand.u32 4294901760, %v856_v36 }
 0x132   : > { %720 = vst.msk [vmem:[#allocation2 + $0xe8] sm:$0xff] %vm326_vm0, %v718_v7  ;;  %v865_v52 = vsel %vm326_vm0, %v774_v9, 0  ;;  %v717_v58 = vmax.f32 %v5191_v29, %v712_v48  ;;  %v1152_v29 = vand.u32 4294901760, %v1151_v45  ;;  %v1171_v9 = vsub.f32 %v5477_v24, %v1170_v23 }
 0x133   : > { %6176 = vst [vmem:[#allocation41_spill] sm:$0xff] %v5497_v60  ;;  %v742_v10 = vpop.permute.xlu1 %741  ;;  %v5505_v37 = vand.u32 4294901760, %v865_v52  ;;  %3697 = vmatmul.mubr.f32.gmra.mrb[16].mxu1 %v1132_v62  ;;  %3892 = vmatmul.mubr.f32.gmra.mrb[18].mxu0 %v1150_v41  ;;  %v1161_v31 = vsub.f32 %v5490_v27, %v1160_v42  ;;  %v5510_v7 = vsub.f32 %v856_v36, %v5501_v11  ;;  %v1190_v61 = vand.u32 4294901760, %v5497_v60  ;;  %v773_v49 = vld [vmem:[#allocation2 + $0xc0] sm:$0xff] }
 0x134   : > { %v746_v57 = vmax.f32 %v5205_v8, %v742_v10  ;;  %719 = vst.msk [vmem:[#allocation2 + $0xe0] sm:$0xff] %vm326_vm0, %v717_v58  ;;  %3699 = vmatprep.mubr.f32.mxu1 %v1142_v22  ;;  %3894 = vmatprep.mubr.f32.mxu0 %v1160_v42  ;;  %v862_v62 = vsel %vm326_vm0, %v773_v49, 0 }
 0x135   : > { %6177 = vst [vmem:[#allocation42_spill] sm:$0xff] %v5510_v7  ;;  %v5517_v41 = vsub.f32 %v865_v52, %v5505_v37  ;;  %v776_v8 = vld [vmem:[#allocation2 + $0xd8] sm:$0xff]  ;;  %v740_v36 = vpop.permute.xlu0 %739  ;;  %v1162_v48 = vand.u32 4294901760, %v1161_v31  ;;  %v1180_v10 = vand.u32 4294901760, %v5510_v7  ;;  %v5521_v27 = vand.u32 4294901760, %v862_v62 }
 0x136   : > { %748 = vst.msk [vmem:[#allocation2 + $0xf8] sm:$0xff] %vm326_vm0, %v746_v57  ;;  %v871_v22 = vsel %vm326_vm0, %v776_v8, 0  ;;  %v745_v45 = vmax.f32 %v5216_v30, %v740_v36  ;;  %v1191_v58 = vsub.f32 %v5497_v60, %v1190_v61  ;;  %v1172_v31 = vand.u32 4294901760, %v1171_v9 }
 0x137   : > { %6178 = vst [vmem:[#allocation43_spill] sm:$0xff] %v5517_v41  ;;  %v5525_v42 = vand.u32 4294901760, %v871_v22  ;;  %3700 = vmatmul.mubr.f32.gmra.mrb[18].mxu1 %v1152_v29  ;;  %3895 = vmatmul.mubr.f32.gmra.mrb[20].mxu0 %v1170_v23  ;;  %v1181_v49 = vsub.f32 %v5510_v7, %v1180_v10  ;;  %v5529_v52 = vsub.f32 %v862_v62, %v5521_v27  ;;  %v775_v57 = vld [vmem:[#allocation2 + $0xd0] sm:$0xff]  ;;  %v1210_v8 = vand.u32 4294901760, %v5517_v41 }
 0x138   : > { %747 = vst.msk [vmem:[#allocation2 + $0xf0] sm:$0xff] %vm326_vm0, %v745_v45  ;;  %3702 = vmatprep.mubr.f32.mxu1 %v1162_v48  ;;  %3897 = vmatprep.mubr.f32.mxu0 %v1180_v10  ;;  %v868_v30 = vsel %vm326_vm0, %v775_v57, 0  ;;  %v1192_v9 = vand.u32 4294901760, %v1191_v58 }
 0x139   : > { %6179 = vst [vmem:[#allocation44_spill] sm:$0xff] %v5529_v52  ;;  %v5536_v29 = vsub.f32 %v871_v22, %v5525_v42  ;;  %v778_v23 = vld [vmem:[#allocation2 + $0xe8] sm:$0xff]  ;;  %v1182_v36 = vand.u32 4294901760, %v1181_v49  ;;  %v1200_v62 = vand.u32 4294901760, %v5529_v52  ;;  %v5539_v7 = vand.u32 4294901760, %v868_v30 }
 0x13a   : > { %v877_v60 = vsel %vm326_vm0, %v778_v23, 0  ;;  %v1211_v45 = vsub.f32 %v5517_v41, %v1210_v8 }
 0x13b   : > { %6180 = vst [vmem:[#allocation45_spill] sm:$0xff] %v5536_v29  ;;  %v5542_v24 = vand.u32 4294901760, %v877_v60  ;;  %3703 = vmatmul.mubr.f32.gmra.mrb[20].mxu1 %v1172_v31  ;;  %3898 = vmatmul.mubr.f32.gmra.mrb[22].mxu0 %v1190_v61  ;;  %v1201_v48 = vsub.f32 %v5529_v52, %v1200_v62  ;;  %v5546_v10 = vsub.f32 %v868_v30, %v5539_v7  ;;  %v777_v22 = vld [vmem:[#allocation2 + $0xe0] sm:$0xff]  ;;  %v1230_v49 = vand.u32 4294901760, %v5536_v29 }
 0x13c   : > { %3705 = vmatprep.mubr.f32.mxu1 %v1182_v36  ;;  %3900 = vmatprep.mubr.f32.mxu0 %v1200_v62  ;;  %v874_v57 = vsel %vm326_vm0, %v777_v22, 0 }
 0x13d   : > { %v5552_v23 = vsub.f32 %v877_v60, %v5542_v24  ;;  %v780_v31 = vld [vmem:[#allocation2 + $0xf8] sm:$0xff]  ;;  %v1202_v61 = vand.u32 4294901760, %v1201_v48  ;;  %v1220_v58 = vand.u32 4294901760, %v5546_v10  ;;  %v5555_v52 = vand.u32 4294901760, %v874_v57 }
 0x13e   : > { %v883_v30 = vsel %vm326_vm0, %v780_v31, 0  ;;  %v1212_v60 = vand.u32 4294901760, %v1211_v45  ;;  %v1231_v48 = vsub.f32 %v5536_v29, %v1230_v49 }
 0x13f   : > { %v5558_v17 = vand.u32 4294901760, %v883_v30  ;;  %3706 = vmatmul.mubr.f32.gmra.mrb[22].mxu1 %v1192_v9  ;;  %3901 = vmatmul.mubr.f32.gmra.mrb[24].mxu0 %v1210_v8  ;;  %v1221_v36 = vsub.f32 %v5546_v10, %v1220_v58  ;;  %v5562_v62 = vsub.f32 %v874_v57, %v5555_v52  ;;  %v779_v22 = vld [vmem:[#allocation2 + $0xf0] sm:$0xff]  ;;  %v1250_v41 = vand.u32 4294901760, %v5552_v23 }
 0x140   : > { %3708 = vmatprep.mubr.f32.mxu1 %v1202_v61  ;;  %3903 = vmatprep.mubr.f32.mxu0 %v1220_v58  ;;  %v880_v16 = vsel %vm326_vm0, %v779_v22, 0  ;;  %v1232_v61 = vand.u32 4294901760, %v1231_v48  ;;  %v6181_v48 = vld [vmem:[#allocation27_spill] sm:$0xff] }
 0x141   : > { %v1222_v31 = vand.u32 4294901760, %v1221_v36  ;;  %v1240_v28 = vand.u32 4294901760, %v5562_v62  ;;  %v5568_v9 = vand.u32 4294901760, %v880_v16  ;;  %v5571_v8 = vsub.f32 %v883_v30, %v5558_v17 }
 0x142   : > { %v1251_v22 = vsub.f32 %v5552_v23, %v1250_v41 }
 0x143   : > { %3709 = vmatmul.mubr.f32.gmra.mrb[24].mxu1 %v1212_v60  ;;  %3904 = vmatmul.mubr.f32.gmra.mrb[26].mxu0 %v1230_v49  ;;  %v1241_v57 = vsub.f32 %v5562_v62, %v1240_v28  ;;  %v5575_v45 = vsub.f32 %v880_v16, %v5568_v9  ;;  %v1270_v29 = vand.u32 4294901760, %v5571_v8 }
 0x144   : > { %3711 = vmatprep.mubr.f32.mxu1 %v1222_v31  ;;  %3906 = vmatprep.mubr.f32.mxu0 %v1240_v28  ;;  %v1252_v49 = vand.u32 4294901760, %v1251_v22  ;;  %v3402_v31 = vld [vmem:[%s6094_s2 + $0x8] ss:$0 sm:$0xff]  ;;  %v3407_v22 = vld [vmem:[%s6094_s2 + $0xd] ss:$0 sm:$0xff] }
 0x145   : > { %v1242_v58 = vand.u32 4294901760, %v1241_v57  ;;  %v1260_v36 = vand.u32 4294901760, %v5575_v45  ;;  %v1271_v16 = vsub.f32 %v5571_v8, %v1270_v29  ;;  %v3403_v57 = vld [vmem:[%s6094_s2 + $0x9] ss:$0 sm:$0xff] }
 0x147   : > { %3712 = vmatmul.mubr.f32.gmra.mrb[26].mxu1 %v1232_v61  ;;  %3907 = vmatmul.mubr.f32.gmra.mrb[28].mxu0 %v1250_v41  ;;  %v1261_v30 = vsub.f32 %v5575_v45, %v1260_v36  ;;  %v1272_v28 = vand.u32 4294901760, %v1271_v16  ;;  %v4560_v41 = vmov 0   ;;  %v3404_v61 = vld [vmem:[%s6094_s2 + $0xa] ss:$0 sm:$0xff] }
 0x148   : > { %3714 = vmatprep.mubr.f32.mxu1 %v1242_v58  ;;  %3909 = vmatprep.mubr.f32.mxu0 %v1260_v36  ;;  %v3405_v58 = vld [vmem:[%s6094_s2 + $0xb] ss:$0 sm:$0xff]  ;;  %v3406_v36 = vld [vmem:[%s6094_s2 + $0xc] ss:$0 sm:$0xff] }
 0x149   : > { %v1262_v60 = vand.u32 4294901760, %v1261_v30  ;;  %4425 = vset.pattern.permute.xlu1 %v4560_v41  ;;  %4424 = vset.pattern.permute.xlu0 %v4560_v41  ;;  %v3408_v30 = vld [vmem:[%s6094_s2 + $0xe] ss:$0 sm:$0xff] }
 0x14b   : > { %3715 = vmatmul.mubr.f32.gmra.mrb[28].mxu1 %v1252_v49  ;;  %3910 = vmatmul.mubr.f32.gmra.mrb[30].mxu0 %v1270_v29  ;;  %v3395_v29 = vld [vmem:[%s6094_s2 + $0x1] ss:$0 sm:$0xff]  ;;  %v3409_v49 = vld [vmem:[%s6094_s2 + $0xf] ss:$0 sm:$0xff] }
 0x14c   : > { %3717 = vmatprep.mubr.f32.mxu1 %v1262_v60  ;;  %3928 = vmatprep.mubr.f32.mxu0 %v5264_v3 }
 0x14d   : > { %3016 = vperm.xlu1 %4425, %v3395_v29  }
 0x14f   : > { %3718 = vmatmul.mubr.f32.gmra.mrb[30].mxu1 %v1272_v28  ;;  %3929 = vmatmul.mubr.f32.vlgmr.msra.gmra.mrb[0].mxu0 %v5284_v21 }
 0x150   : > { %3736 = vmatprep.mubr.f32.mxu1 %v5264_v3  ;;  %3931 = vmatprep.mubr.f32.mxu0 %v5258_v0 }
 0x151   : > { %4123 = vmatpush3.bf16.msra.mxu0 %v4807_v14  ;;  %v3394_v14 = vld [vmem:[%s6094_s2] ss:$0 sm:$0xff] }
 0x152   : > { %4125 = vmatprep.subr.bf16.mxu0 %v6181_v48  ;;  %3012 = vperm.xlu0 %4424, %v3394_v14  }
 0x153   : > { %3737 = vmatmul.mubr.f32.vlgmr.msra.gmra.mrb[0].mxu1 %v5284_v21  ;;  %3932 = vmatmul.mubr.f32.gmra.mrb[2].mxu0 %v5271_v12 }
 0x154   : > { %4075 = vmatpush3.bf16.msra.mxu1 %v5235_v44  ;;  %3739 = vmatprep.mubr.f32.mxu1 %v5258_v0  ;;  %v3398_v44 = vld [vmem:[%s6094_s2 + $0x4] ss:$0 sm:$0xff] }
 0x155   : > { %3934 = vmatprep.mubr.f32.mxu0 %v5304_v55  ;;  %4077 = vmatprep.subr.bf16.mxu1 %v5239_v53 }
 0x156   : > { %4127 = vmatpush3.bf16.msra.mxu0 %v6181_v48 }
 0x157   : > { %3740 = vmatmul.mubr.f32.gmra.mrb[2].mxu1 %v5271_v12  ;;  %3935 = vmatmul.mubr.f32.gmra.mrb[4].mxu0 %v5289_v43 }
 0x158   : > { %3742 = vmatprep.mubr.f32.mxu1 %v5304_v55  ;;  %3937 = vmatprep.mubr.f32.mxu0 %v5326_v5 }
 0x159   : > { %4079 = vmatpush3.bf16.msra.mxu1 %v5239_v53  ;;  %4129 = vmatprep.subr.bf16.mxu0 %v5147_v33  ;;  %v3399_v53 = vld [vmem:[%s6094_s2 + $0x5] ss:$0 sm:$0xff] }
 0x15a   : > { %4081 = vmatprep.subr.bf16.mxu1 %v5242_v56  ;;  %4131 = vmatpush3.bf16.msra.mxu0 %v5147_v33  ;;  %v3396_v33 = vld [vmem:[%s6094_s2 + $0x2] ss:$0 sm:$0xff] }
 0x15b   : > { %3743 = vmatmul.mubr.f32.gmra.mrb[4].mxu1 %v5289_v43  ;;  %3938 = vmatmul.mubr.f32.gmra.mrb[6].mxu0 %v5310_v18 }
 0x15c   : > { %3745 = vmatprep.mubr.f32.mxu1 %v5326_v5  ;;  %3940 = vmatprep.mubr.f32.mxu0 %v5348_v20 }
 0x15d   : > { %4083 = vmatpush3.bf16.msra.mxu1 %v5242_v56  ;;  %4133 = vmatprep.subr.bf16.mxu0 %v5172_v39  ;;  %v3400_v56 = vld [vmem:[%s6094_s2 + $0x6] ss:$0 sm:$0xff] }
 0x15e   : > { %4085 = vmatprep.subr.bf16.mxu1 %v5253_v34  ;;  %4135 = vmatpush3.bf16.msra.mxu0 %v5172_v39  ;;  %v3397_v39 = vld [vmem:[%s6094_s2 + $0x3] ss:$0 sm:$0xff] }
 0x15f   : > { %3746 = vmatmul.mubr.f32.gmra.mrb[6].mxu1 %v5310_v18  ;;  %3941 = vmatmul.mubr.f32.gmra.mrb[8].mxu0 %v5332_v15 }
 0x160   : > { %3748 = vmatprep.mubr.f32.mxu1 %v5348_v20  ;;  %3943 = vmatprep.mubr.f32.mxu0 %v5370_v32 }
 0x161   : > { %4087 = vmatpush3.bf16.msra.mxu1 %v5253_v34  ;;  %3020 = vperm.xlu1 %4425, %v3396_v33   ;;  %v3401_v34 = vld [vmem:[%s6094_s2 + $0x7] ss:$0 sm:$0xff] }
 0x162   : > { %3024 = vperm.xlu0 %4424, %v3397_v39  }
 0x163   : > { %3749 = vmatmul.mubr.f32.gmra.mrb[8].mxu1 %v5332_v15  ;;  %3944 = vmatmul.mubr.f32.gmra.mrb[10].mxu0 %v5353_v46 }
 0x164   : > { %3751 = vmatprep.mubr.f32.mxu1 %v5370_v32  ;;  %3946 = vmatprep.mubr.f32.mxu0 %v5394_v63 }
 0x165   : > { %3028 = vperm.xlu1 %4425, %v3398_v44  }
 0x166   : > { %3032 = vperm.xlu0 %4424, %v3399_v53  }
 0x167   : > { %3752 = vmatmul.mubr.f32.gmra.mrb[10].mxu1 %v5353_v46  ;;  %3947 = vmatmul.mubr.f32.gmra.mrb[12].mxu0 %v5377_v51 }
 0x168   : > { %3754 = vmatprep.mubr.f32.mxu1 %v5394_v63  ;;  %3949 = vmatprep.mubr.f32.mxu0 %v5418_v50 }
 0x169   : > { %3036 = vperm.xlu1 %4425, %v3400_v56  }
 0x16a   : > { %3040 = vperm.xlu0 %4424, %v3401_v34  }
 0x16b   : > { %3755 = vmatmul.mubr.f32.gmra.mrb[12].mxu1 %v5377_v51  ;;  %3950 = vmatmul.mubr.f32.gmra.mrb[14].mxu0 %v5401_v25 }
 0x16c   : > { %3757 = vmatprep.mubr.f32.mxu1 %v5418_v50  ;;  %3952 = vmatprep.mubr.f32.mxu0 %v5441_v13 }
 0x16d   : > { %3044 = vperm.xlu1 %4425, %v3402_v31  }
 0x16e   : > { %3048 = vperm.xlu0 %4424, %v3403_v57  }
 0x16f   : > { %3758 = vmatmul.mubr.f32.gmra.mrb[14].mxu1 %v5401_v25  ;;  %3953 = vmatmul.mubr.f32.gmra.mrb[16].mxu0 %v5424_v19 }
 0x170   : > { %3760 = vmatprep.mubr.f32.mxu1 %v5441_v13  ;;  %3955 = vmatprep.mubr.f32.mxu0 %v5461_v1 }
 0x171   : > { %3052 = vperm.xlu1 %4425, %v3404_v61  }
 0x172   : > { %3056 = vperm.xlu0 %4424, %v3405_v58  }
 0x173   : > { %3761 = vmatmul.mubr.f32.gmra.mrb[16].mxu1 %v5424_v19  ;;  %3956 = vmatmul.mubr.f32.gmra.mrb[18].mxu0 %v5446_v38 }
 0x174   : > { %3763 = vmatprep.mubr.f32.mxu1 %v5461_v1  ;;  %3958 = vmatprep.mubr.f32.mxu0 %v5481_v40 }
 0x175   : > { %3060 = vperm.xlu1 %4425, %v3406_v36  }
 0x176   : > { %3064 = vperm.xlu0 %4424, %v3407_v22  }
 0x177   : > { %3764 = vmatmul.mubr.f32.gmra.mrb[18].mxu1 %v5446_v38  ;;  %3959 = vmatmul.mubr.f32.gmra.mrb[20].mxu0 %v5466_v4 }
 0x178   : > { %3766 = vmatprep.mubr.f32.mxu1 %v5481_v40  ;;  %3961 = vmatprep.mubr.f32.mxu0 %v5501_v11 }
 0x179   : > { %3068 = vperm.xlu1 %4425, %v3408_v30  }
 0x17a   : > { %3072 = vperm.xlu0 %4424, %v3409_v49  }
 0x17b   : > { %3767 = vmatmul.mubr.f32.gmra.mrb[20].mxu1 %v5466_v4  ;;  %3962 = vmatmul.mubr.f32.gmra.mrb[22].mxu0 %v5485_v35 }
 0x17c   : > { %3769 = vmatprep.mubr.f32.mxu1 %v5501_v11  ;;  %3964 = vmatprep.mubr.f32.mxu0 %v5521_v27 }
 0x17f   : > { %3770 = vmatmul.mubr.f32.gmra.mrb[22].mxu1 %v5485_v35  ;;  %3965 = vmatmul.mubr.f32.gmra.mrb[24].mxu0 %v5505_v37 }
 0x180   : > { %3772 = vmatprep.mubr.f32.mxu1 %v5521_v27  ;;  %3967 = vmatprep.mubr.f32.mxu0 %v5539_v7 }
 0x183   : > { %3773 = vmatmul.mubr.f32.gmra.mrb[24].mxu1 %v5505_v37  ;;  %3968 = vmatmul.mubr.f32.gmra.mrb[26].mxu0 %v5525_v42 }
 0x184   : > { %3775 = vmatprep.mubr.f32.mxu1 %v5539_v7  ;;  %3970 = vmatprep.mubr.f32.mxu0 %v5555_v52 }
 0x187   : > { %3776 = vmatmul.mubr.f32.gmra.mrb[26].mxu1 %v5525_v42  ;;  %3971 = vmatmul.mubr.f32.gmra.mrb[28].mxu0 %v5542_v24 }
 0x188   : > { %3778 = vmatprep.mubr.f32.mxu1 %v5555_v52  ;;  %3973 = vmatprep.mubr.f32.mxu0 %v5568_v9 }
 0x18b   : > { %3779 = vmatmul.mubr.f32.gmra.mrb[28].mxu1 %v5542_v24  ;;  %3974 = vmatmul.mubr.f32.gmra.mrb[30].mxu0 %v5558_v17 }
 0x18c   : > { %3781 = vmatprep.mubr.f32.mxu1 %v5568_v9  ;;  %3992 = vmatprep.mubr.f32.mxu0 %v5264_v3  ;;  %v6183_v3 = vld [vmem:[#allocation28_spill] sm:$0xff] }
 0x18f   : > { %3782 = vmatmul.mubr.f32.gmra.mrb[30].mxu1 %v5558_v17  ;;  %3993 = vmatmul.mubr.f32.vlgmr.msra.gmra.mrb[0].mxu0 %v5284_v21  ;;  %v6188_v21 = vld [vmem:[#allocation35_spill] sm:$0xff] }
 0x190   : > { %3800 = vmatprep.mubr.f32.mxu1 %v5275_v26  ;;  %3995 = vmatprep.mubr.f32.mxu0 %v5258_v0  ;;  %v6182_v0 = vld [vmem:[#allocation29_spill] sm:$0xff] }
 0x191   : > { %v6186_v26 = vld [vmem:[#allocation33_spill] sm:$0xff] }
 0x193   : > { %3801 = vmatmul.mubr.f32.vlgmr.msra.gmra.mrb[0].mxu1 %v5294_v2  ;;  %3996 = vmatmul.mubr.f32.gmra.mrb[2].mxu0 %v5271_v12  ;;  %v6185_v12 = vld [vmem:[#allocation30_spill] sm:$0xff]  ;;  %v6190_v2 = vld [vmem:[#allocation37_spill] sm:$0xff] }
 0x194   : > { %3803 = vmatprep.mubr.f32.mxu1 %v5269_v59  ;;  %3998 = vmatprep.mubr.f32.mxu0 %v5304_v55  ;;  %v6184_v59 = vld [vmem:[#allocation31_spill] sm:$0xff]  ;;  %v6192_v55 = vld [vmem:[#allocation24_spill] sm:$0xff] }
 0x197   : > { %3804 = vmatmul.mubr.f32.gmra.mrb[2].mxu1 %v5280_v47  ;;  %3999 = vmatmul.mubr.f32.gmra.mrb[4].mxu0 %v5289_v43  ;;  %v6187_v47 = vld [vmem:[#allocation32_spill] sm:$0xff]  ;;  %v6189_v43 = vld [vmem:[#allocation34_spill] sm:$0xff] }
 0x198   : > { %3806 = vmatprep.mubr.f32.mxu1 %v5315_v6  ;;  %4001 = vmatprep.mubr.f32.mxu0 %v5326_v5  ;;  %v6194_v6 = vld [vmem:[#allocation26_spill] sm:$0xff]  ;;  %v6195_v5 = vld [vmem:[#allocation25_spill] sm:$0xff] }
 0x19b   : > { %3807 = vmatmul.mubr.f32.gmra.mrb[4].mxu1 %v5300_v54  ;;  %4002 = vmatmul.mubr.f32.gmra.mrb[6].mxu0 %v5310_v18  ;;  %v6191_v54 = vld [vmem:[#allocation36_spill] sm:$0xff]  ;;  %v6193_v18 = vld [vmem:[#allocation38_spill] sm:$0xff] }
 0x19c   : > { %3809 = vmatprep.mubr.f32.mxu1 %v6182_v0  ;;  %4004 = vmatprep.mubr.f32.mxu0 %v5348_v20  ;;  %v6197_v20 = vld [vmem:[#allocation39_spill] sm:$0xff] }
 0x19f   : > { %3810 = vmatmul.mubr.f32.gmra.mrb[6].mxu1 %v6183_v3  ;;  %4005 = vmatmul.mubr.f32.gmra.mrb[8].mxu0 %v5332_v15  ;;  %v6196_v15 = vld [vmem:[#allocation40_spill] sm:$0xff] }
 0x1a0   : > { %3812 = vmatprep.mubr.f32.mxu1 %v6184_v59  ;;  %4007 = vmatprep.mubr.f32.mxu0 %v5370_v32  ;;  %v6199_v32 = vld [vmem:[#allocation41_spill] sm:$0xff] }
 0x1a3   : > { %3813 = vmatmul.mubr.f32.gmra.mrb[8].mxu1 %v6185_v12  ;;  %4008 = vmatmul.mubr.f32.gmra.mrb[10].mxu0 %v5353_v46  ;;  %v6198_v46 = vld [vmem:[#allocation42_spill] sm:$0xff] }
 0x1a4   : > { %3815 = vmatprep.mubr.f32.mxu1 %v6186_v26  ;;  %4010 = vmatprep.mubr.f32.mxu0 %v5394_v63  ;;  %v6201_v63 = vld [vmem:[#allocation43_spill] sm:$0xff] }
 0x1a7   : > { %3816 = vmatmul.mubr.f32.gmra.mrb[10].mxu1 %v6187_v47  ;;  %4011 = vmatmul.mubr.f32.gmra.mrb[12].mxu0 %v5377_v51  ;;  %v6200_v51 = vld [vmem:[#allocation44_spill] sm:$0xff] }
 0x1a8   : > { %3818 = vmatprep.mubr.f32.mxu1 %v6188_v21  ;;  %4013 = vmatprep.mubr.f32.mxu0 %v5418_v50 }
 0x1ab   : > { %3819 = vmatmul.mubr.f32.gmra.mrb[12].mxu1 %v6189_v43  ;;  %4014 = vmatmul.mubr.f32.gmra.mrb[14].mxu0 %v5401_v25  ;;  %v6202_v25 = vld [vmem:[#allocation45_spill] sm:$0xff] }
 0x1ac   : > { %3821 = vmatprep.mubr.f32.mxu1 %v6190_v2  ;;  %4016 = vmatprep.mubr.f32.mxu0 %v5441_v13 }
 0x1af   : > { %3822 = vmatmul.mubr.f32.gmra.mrb[14].mxu1 %v6191_v54  ;;  %4017 = vmatmul.mubr.f32.gmra.mrb[16].mxu0 %v5424_v19 }
 0x1b0   : > { %3824 = vmatprep.mubr.f32.mxu1 %v6192_v55  ;;  %4019 = vmatprep.mubr.f32.mxu0 %v5461_v1 }
 0x1b3   : > { %3825 = vmatmul.mubr.f32.gmra.mrb[16].mxu1 %v6193_v18  ;;  %4020 = vmatmul.mubr.f32.gmra.mrb[18].mxu0 %v5446_v38 }
 0x1b4   : > { %3827 = vmatprep.mubr.f32.mxu1 %v6194_v6  ;;  %4022 = vmatprep.mubr.f32.mxu0 %v5481_v40 }
 0x1b7   : > { %3828 = vmatmul.mubr.f32.gmra.mrb[18].mxu1 %v6195_v5  ;;  %4023 = vmatmul.mubr.f32.gmra.mrb[20].mxu0 %v5466_v4 }
 0x1b8   : > { %3830 = vmatprep.mubr.f32.mxu1 %v6196_v15  ;;  %4025 = vmatprep.mubr.f32.mxu0 %v5501_v11 }
 0x1bb   : > { %3831 = vmatmul.mubr.f32.gmra.mrb[20].mxu1 %v6197_v20  ;;  %4026 = vmatmul.mubr.f32.gmra.mrb[22].mxu0 %v5485_v35 }
 0x1bc   : > { %3833 = vmatprep.mubr.f32.mxu1 %v6198_v46  ;;  %4028 = vmatprep.mubr.f32.mxu0 %v5521_v27 }
 0x1bf   : > { %3834 = vmatmul.mubr.f32.gmra.mrb[22].mxu1 %v6199_v32  ;;  %4029 = vmatmul.mubr.f32.gmra.mrb[24].mxu0 %v5505_v37 }
 0x1c0   : > { %3836 = vmatprep.mubr.f32.mxu1 %v6200_v51  ;;  %4031 = vmatprep.mubr.f32.mxu0 %v5539_v7 }
 0x1c3   : > { %3837 = vmatmul.mubr.f32.gmra.mrb[24].mxu1 %v6201_v63  ;;  %4032 = vmatmul.mubr.f32.gmra.mrb[26].mxu0 %v5525_v42 }
 0x1c4   : > { %3839 = vmatprep.mubr.f32.mxu1 %v5546_v10  ;;  %4034 = vmatprep.mubr.f32.mxu0 %v5555_v52 }
 0x1c7   : > { %3840 = vmatmul.mubr.f32.gmra.mrb[26].mxu1 %v6202_v25  ;;  %4035 = vmatmul.mubr.f32.gmra.mrb[28].mxu0 %v5542_v24 }
 0x1c8   : > { %3842 = vmatprep.mubr.f32.mxu1 %v5562_v62  ;;  %4037 = vmatprep.mubr.f32.mxu0 %v5568_v9 }
 0x1cb   : > { %3843 = vmatmul.mubr.f32.gmra.mrb[28].mxu1 %v5552_v23  ;;  %4038 = vmatmul.mubr.f32.gmra.mrb[30].mxu0 %v5558_v17 }
 0x1cc   : > { %3845 = vmatprep.mubr.f32.mxu1 %v5575_v45 }
 0x1cf   : > { %3846 = vmatmul.mubr.f32.gmra.mrb[30].mxu1 %v5571_v8 }
 0x262   : > { %v3994_v50 = vpop.f32.mrb[0].mxu0 }
 0x263   : > { %v2565_v19 = vpop.f32.mrb[1].mxu0 }
 0x266   : > { %v3802_v1 = vpop.f32.mrb[0].mxu1  ;;  %v3997_v40 = vpop.f32.mrb[2].mxu0 }
 0x267   : > { %v5772_v13 = vadd.f32 %v3994_v50, %v3802_v1  ;;  %v1659_v38 = vpop.f32.mrb[1].mxu1  ;;  %v2577_v37 = vpop.f32.mrb[3].mxu0 }
 0x268   : > { %v5774_v4 = vadd.f32 %v2565_v19, %v1659_v38 }
 0x269   : > { %2789 = vrot.lane.b32.xlu1 %v5772_v13, %s4561_s23 }
 0x26a   : > { %v4000_v24 = vpop.f32.mrb[4].mxu0  ;;  %2787 = vrot.lane.b32.xlu0 %v5774_v4, %s4561_s23  ;;  %v3805_v17 = vpop.f32.mrb[2].mxu1 }
 0x26b   : > { %v5780_v35 = vadd.f32 %v3997_v40, %v3805_v17  ;;  %v1673_v27 = vpop.f32.mrb[3].mxu1  ;;  %v2589_v11 = vpop.f32.mrb[5].mxu0 }
 0x26c   : > { %v5782_v7 = vadd.f32 %v2577_v37, %v1673_v27 }
 0x26d   : > { %2793 = vrot.lane.b32.xlu1 %v5780_v35, %s4561_s23 }
 0x26e   : > { %v4003_v42 = vpop.f32.mrb[6].mxu0  ;;  %2791 = vrot.lane.b32.xlu0 %v5782_v7, %s4561_s23  ;;  %v3808_v52 = vpop.f32.mrb[4].mxu1 }
 0x26f   : > { %v5788_v10 = vadd.f32 %v4000_v24, %v3808_v52  ;;  %v1687_v23 = vpop.f32.mrb[5].mxu1  ;;  %v2601_v62 = vpop.f32.mrb[7].mxu0 }
 0x270   : > { %v5790_v9 = vadd.f32 %v2589_v11, %v1687_v23 }
 0x271   : > { %2797 = vrot.lane.b32.xlu1 %v5788_v10, %s4561_s23 }
 0x272   : > { %v4006_v8 = vpop.f32.mrb[8].mxu0  ;;  %2795 = vrot.lane.b32.xlu0 %v5790_v9, %s4561_s23  ;;  %v3811_v45 = vpop.f32.mrb[6].mxu1 }
 0x273   : > { %v5796_v60 = vadd.f32 %v4003_v42, %v3811_v45  ;;  %v1701_v16 = vpop.f32.mrb[7].mxu1  ;;  %v2613_v28 = vpop.f32.mrb[9].mxu0 }
 0x274   : > { %v5798_v41 = vadd.f32 %v2601_v62, %v1701_v16 }
 0x275   : > { %2801 = vrot.lane.b32.xlu1 %v5796_v60, %s4561_s23 }
 0x276   : > { %v4009_v48 = vpop.f32.mrb[10].mxu0  ;;  %2799 = vrot.lane.b32.xlu0 %v5798_v41, %s4561_s23  ;;  %v3814_v29 = vpop.f32.mrb[8].mxu1 }
 0x277   : > { %v5804_v14 = vadd.f32 %v4006_v8, %v3814_v29  ;;  %v1715_v33 = vpop.f32.mrb[9].mxu1  ;;  %v2625_v39 = vpop.f32.mrb[11].mxu0 }
 0x278   : > { %v5806_v44 = vadd.f32 %v2613_v28, %v1715_v33 }
 0x279   : > { %2805 = vrot.lane.b32.xlu1 %v5804_v14, %s4561_s23 }
 0x27a   : > { %v4012_v53 = vpop.f32.mrb[12].mxu0  ;;  %2803 = vrot.lane.b32.xlu0 %v5806_v44, %s4561_s23  ;;  %v3817_v56 = vpop.f32.mrb[10].mxu1 }
 0x27b   : > { %v5812_v34 = vadd.f32 %v4009_v48, %v3817_v56  ;;  %v1729_v31 = vpop.f32.mrb[11].mxu1  ;;  %v2637_v57 = vpop.f32.mrb[13].mxu0 }
 0x27c   : > { %v5814_v61 = vadd.f32 %v2625_v39, %v1729_v31 }
 0x27d   : > { %2809 = vrot.lane.b32.xlu1 %v5812_v34, %s4561_s23 }
 0x27e   : > { %v4015_v58 = vpop.f32.mrb[14].mxu0  ;;  %2807 = vrot.lane.b32.xlu0 %v5814_v61, %s4561_s23  ;;  %v3820_v36 = vpop.f32.mrb[12].mxu1 }
 0x27f   : > { %v5820_v22 = vadd.f32 %v4012_v53, %v3820_v36  ;;  %v1743_v30 = vpop.f32.mrb[13].mxu1  ;;  %v2649_v49 = vpop.f32.mrb[15].mxu0 }
 0x280   : > { %v5822_v0 = vadd.f32 %v2637_v57, %v1743_v30 }
 0x281   : > { %2813 = vrot.lane.b32.xlu1 %v5820_v22, %s4561_s23 }
 0x282   : > { %v4018_v3 = vpop.f32.mrb[16].mxu0  ;;  %2811 = vrot.lane.b32.xlu0 %v5822_v0, %s4561_s23  ;;  %v3823_v59 = vpop.f32.mrb[14].mxu1 }
 0x283   : > { %v5828_v12 = vadd.f32 %v4015_v58, %v3823_v59  ;;  %v1757_v26 = vpop.f32.mrb[15].mxu1  ;;  %v2661_v47 = vpop.f32.mrb[17].mxu0 }
 0x284   : > { %v5830_v21 = vadd.f32 %v2649_v49, %v1757_v26  ;;  %v3017_v26 = vpop.permute.xlu1 %3016 }
 0x285   : > { %2817 = vrot.lane.b32.xlu1 %v5828_v12, %s4561_s23 }
 0x286   : > { %v4021_v43 = vpop.f32.mrb[18].mxu0  ;;  %2815 = vrot.lane.b32.xlu0 %v5830_v21, %s4561_s23  ;;  %v3826_v2 = vpop.f32.mrb[16].mxu1 }
 0x287   : > { %v5836_v54 = vadd.f32 %v4018_v3, %v3826_v2  ;;  %v1771_v55 = vpop.f32.mrb[17].mxu1  ;;  %v2673_v18 = vpop.f32.mrb[19].mxu0 }
 0x288   : > { %v5838_v6 = vadd.f32 %v2661_v47, %v1771_v55  ;;  %v3013_v47 = vpop.permute.xlu0 %3012 }
 0x289   : > { %2821 = vrot.lane.b32.xlu1 %v5836_v54, %s4561_s23 }
 0x28a   : > { %v4024_v5 = vpop.f32.mrb[20].mxu0  ;;  %2819 = vrot.lane.b32.xlu0 %v5838_v6, %s4561_s23  ;;  %v3829_v15 = vpop.f32.mrb[18].mxu1 }
 0x28b   : > { %v5844_v20 = vadd.f32 %v4021_v43, %v3829_v15  ;;  %v1785_v46 = vpop.f32.mrb[19].mxu1  ;;  %v2685_v32 = vpop.f32.mrb[21].mxu0 }
 0x28c   : > { %v5846_v51 = vadd.f32 %v2673_v18, %v1785_v46  ;;  %v3021_v43 = vpop.permute.xlu1 %3020  ;;  %v3025_v2 = vpop.permute.xlu0 %3024 }
 0x28d   : > { %2825 = vrot.lane.b32.xlu1 %v5844_v20, %s4561_s23 }
 0x28e   : > { %v4027_v63 = vpop.f32.mrb[22].mxu0  ;;  %2823 = vrot.lane.b32.xlu0 %v5846_v51, %s4561_s23  ;;  %v3832_v25 = vpop.f32.mrb[20].mxu1 }
 0x28f   : > { %v5852_v50 = vadd.f32 %v4024_v5, %v3832_v25  ;;  %v1799_v19 = vpop.f32.mrb[21].mxu1  ;;  %v2697_v1 = vpop.f32.mrb[23].mxu0 }
 0x290   : > { %v5854_v40 = vadd.f32 %v2685_v32, %v1799_v19  ;;  %v3029_v55 = vpop.permute.xlu1 %3028  ;;  %v5900_v18 = vpop.permute.xlu0 %3032 }
 0x291   : > { %2829 = vrot.lane.b32.xlu1 %v5852_v50, %s4561_s23 }
 0x292   : > { %v4030_v38 = vpop.f32.mrb[24].mxu0  ;;  %2827 = vrot.lane.b32.xlu0 %v5854_v40, %s4561_s23  ;;  %v3835_v37 = vpop.f32.mrb[22].mxu1 }
 0x293   : > { %v5860_v24 = vadd.f32 %v4027_v63, %v3835_v37  ;;  %v1813_v17 = vpop.f32.mrb[23].mxu1  ;;  %v2709_v27 = vpop.f32.mrb[25].mxu0 }
 0x294   : > { %v5862_v11 = vadd.f32 %v2697_v1, %v1813_v17  ;;  %v5902_v5 = vpop.permute.xlu1 %3036  ;;  %v5904_v15 = vpop.permute.xlu0 %3040 }
 0x295   : > { %2833 = vrot.lane.b32.xlu1 %v5860_v24, %s4561_s23 }
 0x296   : > { %v4033_v42 = vpop.f32.mrb[26].mxu0  ;;  %2831 = vrot.lane.b32.xlu0 %v5862_v11, %s4561_s23  ;;  %v3838_v52 = vpop.f32.mrb[24].mxu1 }
 0x297   : > { %v5868_v23 = vadd.f32 %v4030_v38, %v3838_v52  ;;  %v1827_v62 = vpop.f32.mrb[25].mxu1  ;;  %v2721_v8 = vpop.f32.mrb[27].mxu0 }
 0x298   : > { %v5870_v45 = vadd.f32 %v2709_v27, %v1827_v62  ;;  %v5906_v46 = vpop.permute.xlu1 %3044  ;;  %v5908_v32 = vpop.permute.xlu0 %3048 }
 0x299   : > { %2837 = vrot.lane.b32.xlu1 %v5868_v23, %s4561_s23 }
 0x29a   : > { %v4036_v16 = vpop.f32.mrb[28].mxu0  ;;  %2835 = vrot.lane.b32.xlu0 %v5870_v45, %s4561_s23  ;;  %v3841_v28 = vpop.f32.mrb[26].mxu1 }
 0x29b   : > { %v5876_v48 = vadd.f32 %v4033_v42, %v3841_v28  ;;  %v1841_v29 = vpop.f32.mrb[27].mxu1  ;;  %v2733_v33 = vpop.f32.mrb[29].mxu0 }
 0x29c   : > { %v5878_v39 = vadd.f32 %v2721_v8, %v1841_v29  ;;  %v5910_v63 = vpop.permute.xlu1 %3052  ;;  %v5912_v25 = vpop.permute.xlu0 %3056 }
 0x29d   : > { %2841 = vrot.lane.b32.xlu1 %v5876_v48, %s4561_s23 }
 0x29e   : > { %v4039_v53 = vpop.f32.mrb[30].mxu0  ;;  %2839 = vrot.lane.b32.xlu0 %v5878_v39, %s4561_s23  ;;  %v3844_v56 = vpop.f32.mrb[28].mxu1 }
 0x29f   : > { %v5884_v31 = vadd.f32 %v4036_v16, %v3844_v56  ;;  %v1855_v57 = vpop.f32.mrb[29].mxu1  ;;  %v2745_v58 = vpop.f32.mrb[31].mxu0 }
 0x2a0   : > { %v5886_v36 = vadd.f32 %v2733_v33, %v1855_v57  ;;  %v5914_v19 = vpop.permute.xlu1 %3060  ;;  %v5916_v1 = vpop.permute.xlu0 %3064 }
 0x2a1   : > { %2845 = vrot.lane.b32.xlu1 %v5884_v31, %s4561_s23 }
 0x2a2   : > { %2843 = vrot.lane.b32.xlu0 %v5886_v36, %s4561_s23  ;;  %v3847_v30 = vpop.f32.mrb[30].mxu1 }
 0x2a3   : > { %v5892_v49 = vadd.f32 %v4039_v53, %v3847_v30  ;;  %v1869_v3 = vpop.f32.mrb[31].mxu1 }
 0x2a4   : > { %v5894_v59 = vadd.f32 %v2745_v58, %v1869_v3  ;;  %v5918_v38 = vpop.permute.xlu1 %3068  ;;  %v5920_v37 = vpop.permute.xlu0 %3072 }
 0x2a6   : > { %2849 = vrot.lane.b32.xlu0 %v5892_v49, %s4561_s23  ;;  %2847 = vrot.lane.b32.xlu1 %v5894_v59, %s4561_s23 }
 0x2db   : > { %v2790_v17 = vpop.permute.xlu1 %2789 }
 0x2dc   : > { %v2884_v27 = vmax.f32 %v5772_v13, %v2790_v17  ;;  %v2788_v42 = vpop.permute.xlu0 %2787 }
 0x2dd   : > { %v2883_v52 = vmax.f32 %v5774_v4, %v2788_v42 }
 0x2de   : > { %v3076_v62 = vadd.f32 %v3013_v47, %v2884_v27 }
 0x2df   : > { %v3075_v8 = vadd.f32 %v3013_v47, %v2883_v52  ;;  %v2794_v16 = vpop.permute.xlu1 %2793 }
 0x2e0   : > { %v3108_v28 = vmax.f32 %v3076_v62, 0.0  ;;  %v2886_v29 = vmax.f32 %v5780_v35, %v2794_v16  ;;  %v2792_v33 = vpop.permute.xlu0 %2791 }
 0x2e1   : > { %v3107_v53 = vmax.f32 %v3075_v8, 0.0  ;;  %v2885_v56 = vmax.f32 %v5782_v7, %v2792_v33 }
 0x2e2   : > { %3141 = vst.msk [vmem:[%s5927_s8 + $0x8] sm:$0xff] %vm3139_vm1, %v3108_v28  ;;  %v3078_v13 = vadd.f32 %v3017_v26, %v2886_v29 }
 0x2e3   : > { %3140 = vst.msk [vmem:[%s5927_s8] sm:$0xff] %vm3139_vm1, %v3107_v53  ;;  %v3077_v4 = vadd.f32 %v3017_v26, %v2885_v56  ;;  %v2798_v57 = vpop.permute.xlu1 %2797 }
 0x2e4   : > { %v3110_v58 = vmax.f32 %v3078_v13, 0.0  ;;  %v2888_v35 = vmax.f32 %v5788_v10, %v2798_v57  ;;  %v2796_v30 = vpop.permute.xlu0 %2795 }
 0x2e5   : > { %v3109_v7 = vmax.f32 %v3077_v4, 0.0  ;;  %v2887_v3 = vmax.f32 %v5790_v9, %v2796_v30 }
 0x2e6   : > { %3143 = vst.msk [vmem:[%s5927_s8 + $0x18] sm:$0xff] %vm3139_vm1, %v3110_v58  ;;  %v3080_v47 = vadd.f32 %v3021_v43, %v2888_v35 }
 0x2e7   : > { %3142 = vst.msk [vmem:[%s5927_s8 + $0x10] sm:$0xff] %vm3139_vm1, %v3109_v7  ;;  %v3079_v17 = vadd.f32 %v3021_v43, %v2887_v3  ;;  %v2802_v27 = vpop.permute.xlu1 %2801 }
 0x2e8   : > { %v3112_v42 = vmax.f32 %v3080_v47, 0.0  ;;  %v2890_v26 = vmax.f32 %v5796_v60, %v2802_v27  ;;  %v2800_v52 = vpop.permute.xlu0 %2799 }
 0x2e9   : > { %v3111_v62 = vmax.f32 %v3079_v17, 0.0  ;;  %v2889_v10 = vmax.f32 %v5798_v41, %v2800_v52 }
 0x2ea   : > { %3145 = vst.msk [vmem:[%s5927_s8 + $0x28] sm:$0xff] %vm3139_vm1, %v3112_v42  ;;  %v3082_v8 = vadd.f32 %v3025_v2, %v2890_v26 }
 0x2eb   : > { %3144 = vst.msk [vmem:[%s5927_s8 + $0x20] sm:$0xff] %vm3139_vm1, %v3111_v62  ;;  %v3081_v9 = vadd.f32 %v3025_v2, %v2889_v10  ;;  %v2806_v16 = vpop.permute.xlu1 %2805 }
 0x2ec   : > { %v3114_v28 = vmax.f32 %v3082_v8, 0.0  ;;  %v2892_v43 = vmax.f32 %v5804_v14, %v2806_v16  ;;  %v2804_v29 = vpop.permute.xlu0 %2803 }
 0x2ed   : > { %v3113_v33 = vmax.f32 %v3081_v9, 0.0  ;;  %v2891_v60 = vmax.f32 %v5806_v44, %v2804_v29 }
 0x2ee   : > { %3147 = vst.msk [vmem:[%s5927_s8 + $0x38] sm:$0xff] %vm3139_vm1, %v3114_v28  ;;  %v3084_v53 = vadd.f32 %v3029_v55, %v2892_v43 }
 0x2ef   : > { %3146 = vst.msk [vmem:[%s5927_s8 + $0x30] sm:$0xff] %vm3139_vm1, %v3113_v33  ;;  %v3083_v41 = vadd.f32 %v3029_v55, %v2891_v60  ;;  %v2810_v56 = vpop.permute.xlu1 %2809 }
 0x2f0   : > { %v3116_v13 = vmax.f32 %v3084_v53, 0.0  ;;  %v2894_v2 = vmax.f32 %v5812_v34, %v2810_v56  ;;  %v2808_v4 = vpop.permute.xlu0 %2807 }
 0x2f1   : > { %v3115_v57 = vmax.f32 %v3083_v41, 0.0  ;;  %v2893_v14 = vmax.f32 %v5814_v61, %v2808_v4 }
 0x2f2   : > { %3149 = vst.msk [vmem:[%s5927_s8 + $0x48] sm:$0xff] %vm3139_vm1, %v3116_v13  ;;  %v3086_v44 = vadd.f32 %v5900_v18, %v2894_v2 }
 0x2f3   : > { %3148 = vst.msk [vmem:[%s5927_s8 + $0x40] sm:$0xff] %vm3139_vm1, %v3115_v57  ;;  %v3085_v58 = vadd.f32 %v5900_v18, %v2893_v14  ;;  %v2814_v35 = vpop.permute.xlu1 %2813 }
 0x2f4   : > { %v3118_v55 = vmax.f32 %v3086_v44, 0.0  ;;  %v2896_v30 = vmax.f32 %v5820_v22, %v2814_v35  ;;  %v2812_v34 = vpop.permute.xlu0 %2811 }
 0x2f5   : > { %v3117_v7 = vmax.f32 %v3085_v58, 0.0  ;;  %v2895_v3 = vmax.f32 %v5822_v0, %v2812_v34 }
 0x2f6   : > { %3151 = vst.msk [vmem:[%s5927_s8 + $0x58] sm:$0xff] %vm3139_vm1, %v3118_v55  ;;  %v3088_v61 = vadd.f32 %v5902_v5, %v2896_v30 }
 0x2f7   : > { %3150 = vst.msk [vmem:[%s5927_s8 + $0x50] sm:$0xff] %vm3139_vm1, %v3117_v7  ;;  %v3087_v47 = vadd.f32 %v5902_v5, %v2895_v3  ;;  %v2818_v17 = vpop.permute.xlu1 %2817 }
 0x2f8   : > { %v3120_v18 = vmax.f32 %v3088_v61, 0.0  ;;  %v2898_v27 = vmax.f32 %v5828_v12, %v2818_v17  ;;  %v2816_v22 = vpop.permute.xlu0 %2815 }
 0x2f9   : > { %v3119_v42 = vmax.f32 %v3087_v47, 0.0  ;;  %v2897_v26 = vmax.f32 %v5830_v21, %v2816_v22 }
 0x2fa   : > { %3153 = vst.msk [vmem:[%s5927_s8 + $0x68] sm:$0xff] %vm3139_vm1, %v3120_v18  ;;  %v3090_v0 = vadd.f32 %v5904_v15, %v2898_v27 }
 0x2fb   : > { %3152 = vst.msk [vmem:[%s5927_s8 + $0x60] sm:$0xff] %vm3139_vm1, %v3119_v42  ;;  %v3089_v52 = vadd.f32 %v5904_v15, %v2897_v26  ;;  %v2822_v62 = vpop.permute.xlu1 %2821 }
 0x2fc   : > { %v3122_v5 = vmax.f32 %v3090_v0, 0.0  ;;  %v2900_v10 = vmax.f32 %v5836_v54, %v2822_v62  ;;  %v2820_v12 = vpop.permute.xlu0 %2819 }
 0x2fd   : > { %v3121_v8 = vmax.f32 %v3089_v52, 0.0  ;;  %v2899_v9 = vmax.f32 %v5838_v6, %v2820_v12 }
 0x2fe   : > { %3155 = vst.msk [vmem:[%s5927_s8 + $0x78] sm:$0xff] %vm3139_vm1, %v3122_v5  ;;  %v3092_v21 = vadd.f32 %v5906_v46, %v2900_v10 }
 0x2ff   : > { %3154 = vst.msk [vmem:[%s5927_s8 + $0x70] sm:$0xff] %vm3139_vm1, %v3121_v8  ;;  %v3091_v16 = vadd.f32 %v5906_v46, %v2899_v9  ;;  %v2826_v28 = vpop.permute.xlu1 %2825 }
 0x300   : > { %v3124_v15 = vmax.f32 %v3092_v21, 0.0  ;;  %v2902_v43 = vmax.f32 %v5844_v20, %v2826_v28  ;;  %v2824_v54 = vpop.permute.xlu0 %2823 }
 0x301   : > { %v3123_v29 = vmax.f32 %v3091_v16, 0.0  ;;  %v2901_v33 = vmax.f32 %v5846_v51, %v2824_v54 }
 0x302   : > { %3157 = vst.msk [vmem:[%s5927_s8 + $0x88] sm:$0xff] %vm3139_vm1, %v3124_v15  ;;  %v3094_v6 = vadd.f32 %v5908_v32, %v2902_v43 }
 0x303   : > { %3156 = vst.msk [vmem:[%s5927_s8 + $0x80] sm:$0xff] %vm3139_vm1, %v3123_v29  ;;  %v3093_v60 = vadd.f32 %v5908_v32, %v2901_v33  ;;  %v2830_v53 = vpop.permute.xlu1 %2829 }
 0x304   : > { %v3126_v46 = vmax.f32 %v3094_v6, 0.0  ;;  %v2904_v41 = vmax.f32 %v5852_v50, %v2830_v53  ;;  %v2828_v20 = vpop.permute.xlu0 %2827 }
 0x305   : > { %v3125_v56 = vmax.f32 %v3093_v60, 0.0  ;;  %v2903_v13 = vmax.f32 %v5854_v40, %v2828_v20 }
 0x306   : > { %3159 = vst.msk [vmem:[%s5927_s8 + $0x98] sm:$0xff] %vm3139_vm1, %v3126_v46  ;;  %v3096_v51 = vadd.f32 %v5910_v63, %v2904_v41 }
 0x307   : > { %3158 = vst.msk [vmem:[%s5927_s8 + $0x90] sm:$0xff] %vm3139_vm1, %v3125_v56  ;;  %v3095_v2 = vadd.f32 %v5910_v63, %v2903_v13  ;;  %v2834_v4 = vpop.permute.xlu1 %2833 }
 0x308   : > { %v3128_v32 = vmax.f32 %v3096_v51, 0.0  ;;  %v2906_v57 = vmax.f32 %v5860_v24, %v2834_v4  ;;  %v2832_v50 = vpop.permute.xlu0 %2831 }
 0x309   : > { %v3127_v14 = vmax.f32 %v3095_v2, 0.0  ;;  %v2905_v44 = vmax.f32 %v5862_v11, %v2832_v50 }
 0x30a   : > { %3161 = vst.msk [vmem:[%s5927_s8 + $0xa8] sm:$0xff] %vm3139_vm1, %v3128_v32  ;;  %v3098_v40 = vadd.f32 %v5912_v25, %v2906_v57 }
 0x30b   : > { %3160 = vst.msk [vmem:[%s5927_s8 + $0xa0] sm:$0xff] %vm3139_vm1, %v3127_v14  ;;  %v3097_v58 = vadd.f32 %v5912_v25, %v2905_v44  ;;  %v2838_v35 = vpop.permute.xlu1 %2837 }
 0x30c   : > { %v3130_v63 = vmax.f32 %v3098_v40, 0.0  ;;  %v2908_v55 = vmax.f32 %v5868_v23, %v2838_v35  ;;  %v2836_v24 = vpop.permute.xlu0 %2835 }
 0x30d   : > { %v3129_v30 = vmax.f32 %v3097_v58, 0.0  ;;  %v2907_v34 = vmax.f32 %v5870_v45, %v2836_v24 }
 0x30e   : > { %3163 = vst.msk [vmem:[%s5927_s8 + $0xb8] sm:$0xff] %vm3139_vm1, %v3130_v63  ;;  %v3100_v11 = vadd.f32 %v5914_v19, %v2908_v55 }
 0x30f   : > { %3162 = vst.msk [vmem:[%s5927_s8 + $0xb0] sm:$0xff] %vm3139_vm1, %v3129_v30  ;;  %v3099_v7 = vadd.f32 %v5914_v19, %v2907_v34  ;;  %v2842_v3 = vpop.permute.xlu1 %2841 }
 0x310   : > { %v3132_v25 = vmax.f32 %v3100_v11, 0.0  ;;  %v2910_v61 = vmax.f32 %v5876_v48, %v2842_v3  ;;  %v2840_v23 = vpop.permute.xlu0 %2839 }
 0x311   : > { %v3131_v47 = vmax.f32 %v3099_v7, 0.0  ;;  %v2909_v17 = vmax.f32 %v5878_v39, %v2840_v23 }
 0x312   : > { %3165 = vst.msk [vmem:[%s5927_s8 + $0xc8] sm:$0xff] %vm3139_vm1, %v3132_v25  ;;  %v3102_v45 = vadd.f32 %v5916_v1, %v2910_v61 }
 0x313   : > { %3164 = vst.msk [vmem:[%s5927_s8 + $0xc0] sm:$0xff] %vm3139_vm1, %v3131_v47  ;;  %v3101_v18 = vadd.f32 %v5916_v1, %v2909_v17  ;;  %v2846_v27 = vpop.permute.xlu1 %2845 }
 0x314   : > { %v3134_v19 = vmax.f32 %v3102_v45, 0.0  ;;  %v2912_v22 = vmax.f32 %v5884_v31, %v2846_v27  ;;  %v2844_v48 = vpop.permute.xlu0 %2843 }
 0x315   : > { %v3133_v42 = vmax.f32 %v3101_v18, 0.0  ;;  %v2911_v26 = vmax.f32 %v5886_v36, %v2844_v48 }
 0x316   : > { %3167 = vst.msk [vmem:[%s5927_s8 + $0xd8] sm:$0xff] %vm3139_vm1, %v3134_v19  ;;  %v3104_v39 = vadd.f32 %v5918_v38, %v2912_v22 }
 0x317   : > { %3166 = vst.msk [vmem:[%s5927_s8 + $0xd0] sm:$0xff] %vm3139_vm1, %v3133_v42  ;;  %v3103_v1 = vadd.f32 %v5918_v38, %v2911_v26 }
 0x318   : > { %v3136_v0 = vmax.f32 %v3104_v39, 0.0  ;;  %v2848_v52 = vpop.permute.xlu1 %2847  ;;  %v2850_v62 = vpop.permute.xlu0 %2849 }
 0x319   : > { %v3135_v5 = vmax.f32 %v3103_v1, 0.0  ;;  %v2913_v31 = vmax.f32 %v5894_v59, %v2848_v52  ;;  %v2914_v10 = vmax.f32 %v5892_v49, %v2850_v62 }
 0x31a   : > { %3169 = vst.msk [vmem:[%s5927_s8 + $0xe8] sm:$0xff] %vm3139_vm1, %v3136_v0 }
 0x31b   : > { %3168 = vst.msk [vmem:[%s5927_s8 + $0xe0] sm:$0xff] %vm3139_vm1, %v3135_v5  ;;  %v3105_v36 = vadd.f32 %v5920_v37, %v2913_v31  ;;  %v3106_v12 = vadd.f32 %v5920_v37, %v2914_v10 }
 0x31d   : > { %v3137_v8 = vmax.f32 %v3105_v36, 0.0  ;;  %v3138_v9 = vmax.f32 %v3106_v12, 0.0 }
 0x31f   : > { %3170 = vst.msk [vmem:[%s5927_s8 + $0xf0] sm:$0xff] %vm3139_vm1, %v3137_v8  ;;  %3171 = vst.msk [vmem:[%s5927_s8 + $0xf8] sm:$0xff] %vm3139_vm1, %v3138_v9 }
 0x320   : > { %s3411_s27 = sshll.u32 %s4531_s18, 1  ;;  %s3412_s24 = sshll.u32 %s4535_s19, 6 }
 0x321   : > { %s3185_s1 = sadd.s32 %s3412_s24, %s3411_s27  ;;  %s3204_s7 = sshll.u32 %s5927_s8, 4  ;;  %s3205_s7 = int_to_ptr.vmem [resolvable:$true] %s3204_s7 }
 0x322   : > { %s3413_s21 = sshll.u32 %s3185_s1, 7  ;;  %s4562_s26 = smov 256  }
 0x323   : > { %s3187_s3 = scalar_lea.hbm %s6096_s4, %s3413_s21  ;;  %p6203_p8 = scmp.ne.s32.totalorder %s6140_s6, 0 }
 0x324   : > { %s4563_s5 = smov 512   ;;  %s4564_s12 = smov 2  }
 0x325   : > { %4316 = sst [smem:[#allocation14]] (%p6203_p8), %s4562_s26  ;;  %s4565_s18 = smov 128  }
 0x326   : > { %4317 = sst [smem:[#allocation14 + $0x1]] (%p6203_p8), %s4563_s5  ;;  %s4566_s19 = smov 8  }
 0x327   : > { %4318 = sst [smem:[#allocation14 + $0x2]] (%p6203_p8), %s4564_s12  ;;  %s4567_s14 = smov [#allocation13]  }
 0x328   : > { %4319 = sst [smem:[#allocation14 + $0x3]] (%p6203_p8), %s4565_s18  ;;  %s4568_s25 = smov 0  }
 0x329   : > { %4320 = sst [smem:[#allocation14 + $0x4]] (%p6203_p8), %s4565_s18 }
 0x32a   : > { %4321 = sst [smem:[#allocation14 + $0x5]] (%p6203_p8), %s4566_s19 }
 0x32b   : > { %4322 = dma.general (%p6203_p8), %s3205_s7, 4096, %s3187_s3, %s3173_s28, %s4567_s14, [#allocation14], %s4568_s25, 0  }
 0x32c PF: > { %p4339_p9 = scmp.ge.s32.totalorder %s4547_s22, 2  ;;  %s3232_s30 = sand.u32 1, %s4519_s15  }
 0x32d   : > { %p6204_p2 = scmp.ne.s32.totalorder %s6141_s9, 0  ;;  %s3233_s10 = scalar_lea.sflag [#allocation5], %s3232_s30 }
 0x32f   : > { %p4332_p4 = pnand %p4339_p9, %p6204_p2 }
 0x331   : > { %4514 = dma.done.wait (!%p4332_p4), %s3233_s10, 4096  }
 0x332   : > { %4516 = vsyncadd (!%p4332_p4), %s3233_s10, 4294963200  ;;  %s22_s22 = sadd.s32 1, %s4547_s22   ;;  %s6205_s23 = sld [smem:[#allocation23_spill]] }
 0x333   : > { %p19_p7 = scmp.ge.s32.totalorder %s22_s22, 6   ;;  %s6206_s19 = sld [smem:[#allocation20_spill]] }
 0x334   : > { %s6207_s6 = sld [smem:[#allocation21_spill]]  ;;  %s6208_s21 = sld [smem:[#allocation22_spill]] }
 0x335   : > { %s6209_s15 = smov %s4523_s16  ;;  %s6210_s16 = smov %s4527_s17 }
 0x336   : > { %s6212_s18 = smov %s4539_s20  ;;  %21 = sbr.rel (!%p19_p7) target bundleno = 12 (0xc), region = 102 }
 0x338   : > { %s6211_s17 = smov %s6205_s23 }
 0x33a   : > { %s6213_s20 = smov %s6207_s6 }
 0x33d   :  { %3238 = vsyncpa [#allocation4], 1 }
 0x33e   :  { %3240 = vsyncpa [#allocation4 + $0x1], 1 }
 0x33f   :  { %3241 = vsyncpa [#allocation9], 1 }
 0x340   :  { %3242 = vsyncpa [#allocation5], 1 }
 0x341   :  { %3244 = vsyncpa [#allocation5 + $0x1], 1 }
 0x342   :  { %3245 = vsyncpa [#allocation6], 1 }
 0x343   :  { %3247 = vsyncpa [#allocation6 + $0x1], 1 }

</bundles_post_ra>
